<compile_context>
chip_gen: v7x
topology: tpu7x:2x2x1
jax: 0.10.0
libtpu: 0.0.40
codegen_flags: <defaults>
</compile_context>

<pallas_src>
from functools import partial
import math

import jax
import jax.numpy as jnp
from jax import lax
from jax.experimental import pallas as pl
from jax.experimental.pallas import tpu as pltpu


# ----------------------------------------------------------------------------
# Pallas kernel.
# ----------------------------------------------------------------------------
def _causal_conv_kernel(x_ref, w_ref, b_ref, o_ref, *scratch, KH, KW, C_in, W,
                        Wr, R, left, base, L_strip, manual_dma, fused_slab,
                        group_rows):
    # x_ref : manual_dma -> full (N, C_in, L) HBM ref (pl.ANY)
    #         else        -> (1, C_in, L) auto-pipelined VMEM block
    # w_ref : (C_out, K_tot)  tap-major im2col weights (grid invariant)
    # b_ref : (C_out, 1)      f32 bias (grid invariant)
    # o_ref : (1, C_out, M)   NCHW-flat lane-dense output strip, M = R*Wr
    M = R * Wr
    K = KH * KW

    if manual_dma:
        xbuf_ref, sem = scratch[0], scratch[1]
        rest = scratch[2:]
        n = pl.program_id(0)
        s = pl.program_id(1)
        start = s * M
        if M % 128 == 0:
            start = pl.multiple_of(start, 128)
        cp = pltpu.make_async_copy(x_ref.at[n, :, pl.ds(start, L_strip)],
                                   xbuf_ref, sem.at[0])
        cp.start()
        # TODO(synk): prefetch strip s+1 here once the strip axis is allowed
        #             to be "arbitrary" (see module-level TODO).
        cp.wait()

        def load_window(off):
            return xbuf_ref[:, off:off + M]
    else:
        rest = scratch

        def load_window(off):
            return x_ref[0, :, off:off + M]

    # Horizontal ZeroPad2d folded into per-shift lane masks.  Only KW distinct
    # shifts -> hoisted out of the kh loop, built once from a (1, M) iota and
    # broadcast inside the select (left/right conditions merged).
    masks = {}
    col = None
    for kw in range(KW):
        shift = kw - left
        if shift < 0 or shift + Wr - 1 >= W:
            if col is None:
                col = lax.broadcasted_iota(jnp.int32, (1, M), 1) % Wr
            src = col + shift
            masks[shift] = (src >= 0) & (src < W)

    def window(t):
        kh, kw = divmod(t, KW)
        shift = kw - left
        win = load_window(base + kh * Wr + shift)       # (C_in, M), pure lane offset
        if shift in masks:
            win = jnp.where(masks[shift], win, 0)
        return win

    if fused_slab:
        # Tiny C_in: single fused MXU contraction over the im2col slab.
        # Taps are grouped so every slab store writes whole sublane tiles.
        slab_ref = rest[0]
        gtaps = max(1, group_rows // C_in)
        for g0 in range(0, K, gtaps):
            parts = [window(t) for t in range(g0, min(g0 + gtaps, K))]
            blk = parts[0] if len(parts) == 1 else jnp.concatenate(parts, axis=0)
            slab_ref[g0 * C_in:g0 * C_in + blk.shape[0], :] = blk
        acc = jnp.dot(w_ref[...], slab_ref[...],
                      preferred_element_type=jnp.float32)
    else:
        # Large C_in: per-tap accumulation (contraction depth C_in per dot),
        # no slab, mask/select overlaps the vmatmuls.
        acc = None
        for t in range(K):
            part = jnp.dot(w_ref[:, t * C_in:(t + 1) * C_in], window(t),
                           preferred_element_type=jnp.float32)
            acc = part if acc is None else acc + part

    acc = acc + b_ref[...]                               # (C_out, 1) broadcasts
    o_ref[0] = acc.astype(o_ref.dtype)


# ----------------------------------------------------------------------------
# Wrapper around pallas_call.
# ----------------------------------------------------------------------------
def _vmem_capacity_bytes():
    """Physical VMEM per TensorCore; conservative (v7x) fallback."""
    try:
        info = pltpu.get_tpu_info()
        cap = getattr(info, "vmem_capacity_bytes", None)
        if cap:
            return int(cap)
    except Exception:
        pass
    return 64 << 20


def _conv2d_pallas(x_flat, w_mat, bias2, *, KH, KW, W, Wr, H_out, left, base,
                   head, tail, strip_budget_bytes=None):
    N, C_in, L = x_flat.shape
    C_out, K_tot = w_mat.shape
    itemsize = x_flat.dtype.itemsize
    w_itemsize = w_mat.dtype.itemsize

    # Fused slab only for tiny C_in (per-tap contraction would starve the MXU).
    fused_slab = C_in < 32
    group_rows = 32 // itemsize            # sublane rows per (8,128) tile

    # Generation-aware VMEM cap (v7x 64 MiB/TC, v5e/v6e 128 MiB).
    cap = int(_vmem_capacity_bytes() * 0.85)
    budget = (strip_budget_bytes if strip_budget_bytes is not None
              else min(24 << 20, cap // 3))

    # --- choose the largest row strip (R | H_out, lane-dense R*Wr) in budget.
    best, smallest = None, None
    for R in range(1, H_out + 1):
        if H_out % R:
            continue
        M_s = R * Wr
        if (M_s % 128) and R != H_out:
            continue                         # keep output stores lane dense
        L_s = (head + R + KH - 1 + tail) * Wr
        foot = (2 * C_in * L_s * itemsize            # input strip (+ dbl-buf slack)
                + 2 * C_out * M_s * itemsize         # output block (double buffered)
                + 2 * C_out * M_s * 4                # f32 accumulator + headroom
                + 4 * C_in * M_s * itemsize          # tap-window temporaries
                + 2 * C_out * K_tot * w_itemsize)    # weights (+ slack)
        if fused_slab:
            foot += K_tot * M_s * itemsize           # im2col slab scratch
        if smallest is None or foot < smallest[1]:
            smallest = (R, foot)
        if foot <= budget:
            best = (R, foot)
    if best is None:
        # TODO(synk): also tile the lane (column) axis for images whose
        #             single-row strips still exceed the budget.
        best = smallest
    R, foot = best
    n_strips = H_out // R
    M_strip = R * Wr
    L_strip = (head + R + KH - 1 + tail) * Wr
    manual_dma = n_strips > 1

    vmem_limit = int(min(cap, max(32 << 20, int(1.5 * foot) + (8 << 20))))

    cost = pl.CostEstimate(
        flops=2 * N * C_out * K_tot * H_out * Wr,
        transcendentals=0,
        bytes_accessed=(x_flat.size * itemsize
                        + w_mat.size * w_itemsize
                        + bias2.size * bias2.dtype.itemsize
                        + N * C_out * H_out * Wr * itemsize))

    kernel = partial(_causal_conv_kernel, KH=KH, KW=KW, C_in=C_in, W=W, Wr=Wr,
                     R=R, left=left, base=base, L_strip=L_strip,
                     manual_dma=manual_dma, fused_slab=fused_slab,
                     group_rows=group_rows)

    if manual_dma:
        x_spec = pl.BlockSpec(memory_space=pl.ANY)   # raw HBM ref; strips DMA'd in-kernel
    else:
        x_spec = pl.BlockSpec((1, C_in, L), lambda n, s: (n, 0, 0))

    scratch = []
    if manual_dma:
        scratch.append(pltpu.VMEM((C_in, L_strip), x_flat.dtype))
        scratch.append(pltpu.SemaphoreType.DMA((1,)))
    if fused_slab:
        scratch.append(pltpu.VMEM((K_tot, M_strip), x_flat.dtype))

    def build(single_buffer_invariant):
        extra = ({"pipeline_mode": pl.Buffered(1)}
                 if single_buffer_invariant else {})
        w_spec = pl.BlockSpec((C_out, K_tot), lambda n, s: (0, 0), **extra)
        b_spec = pl.BlockSpec((C_out, 1), lambda n, s: (0, 0), **extra)
        return pl.pallas_call(
            kernel,
            out_shape=jax.ShapeDtypeStruct((N, C_out, H_out * Wr), x_flat.dtype),
            grid_spec=pltpu.PrefetchScalarGridSpec(
                num_scalar_prefetch=0,
                grid=(N, n_strips),
                in_specs=[x_spec, w_spec, b_spec],
                out_specs=pl.BlockSpec((1, C_out, M_strip),
                                       lambda n, s: (n, 0, s)),
                scratch_shapes=scratch),
            compiler_params=pltpu.CompilerParams(
                dimension_semantics=("parallel", "parallel"),
                vmem_limit_bytes=vmem_limit),
            cost_estimate=cost)

    try:
        return build(True)(x_flat, w_mat, bias2)
    except Exception:
        # Fallback if single-buffering grid-invariant operands is unsupported.
        return build(False)(x_flat, w_mat, bias2)


# ----------------------------------------------------------------------------
# CausalConv2d module (params + glue in plain JAX, hot path in Pallas).
# ----------------------------------------------------------------------------
class CausalConv2dPallas:
    def __init__(self, in_channel, out_channel, kernel_size, stride=1,
                 padding='downright', *, key, strip_budget_bytes=None):
        if padding not in ['downright', 'down', 'causal']:
            raise ValueError(f'Wrong padding: {padding}')
        if stride != 1:
            raise NotImplementedError  # TODO(synk): stride != 1 unused here
        if isinstance(kernel_size, int):
            kernel_size = [kernel_size] * 2
        self.kernel_size = tuple(kernel_size)
        KH, KW = self.kernel_size

        if padding == 'downright':
            self.pad = (KW - 1, 0, KH - 1, 0)          # (left, right, top, bottom)
        else:  # 'down' or 'causal'
            self.pad = (KW // 2, KW // 2, KH - 1, 0)
        self.causal = KW // 2 if padding == 'causal' else 0
        self.strip_budget_bytes = strip_budget_bytes

        # weight_norm parameterization: weight = g * v / ||v|| (per out channel)
        k1, _, k3 = jax.random.split(key, 3)
        fan_in = in_channel * KH * KW
        bound = 1.0 / math.sqrt(fan_in)
        v = jax.random.uniform(k1, (out_channel, in_channel, KH, KW),
                               jnp.float32, -bound, bound)           # weight_v
        g = jnp.sqrt(jnp.sum(v * v, axis=(1, 2, 3), keepdims=True))  # weight_g
        b = jax.random.uniform(k3, (out_channel,), jnp.float32, -bound, bound)
        self.weight_v = v
        self.weight_g = g
        self.bias = b
        self.out_channel = out_channel

    def _effective_weight(self):
        v = self.weight_v
        if self.causal > 0:
            # matches: self.conv.weight_v.data[:, :, -1, self.causal:].zero_()
            v = v.at[:, :, -1, self.causal:].set(0.0)
        norm = jnp.sqrt(jnp.sum(v * v, axis=(1, 2, 3), keepdims=True))
        return self.weight_g * v / norm                  # (Cout, Cin, KH, KW)

    def __call__(self, x_nchw):
        N, C_in, H, W = x_nchw.shape
        KH, KW = self.kernel_size
        left, right, top, bottom = self.pad              # top = KH-1, bottom = 0
        H_out = H + top + bottom - KH + 1                # == H
        W_out = W + left + right - KW + 1
        Wr = W_out                                       # flat row stride

        # Guard rows so every tap's lane-offset slice stays in bounds.
        head = -(-left // Wr) if left > 0 else 0
        tail_e = max(0, (KW - 1) - left)
        tail = -(-tail_e // Wr) if tail_e > 0 else 0
        base = head * Wr

        # Single pad op (vertical causal pad + guard rows + row-stride pad),
        # then a free contiguous reshape to the flat layout.  No transposes.
        xp = jnp.pad(x_nchw, ((0, 0), (0, 0),
                              (head + KH - 1, tail), (0, Wr - W)))
        L = (head + KH - 1 + H + tail) * Wr
        x_flat = xp.reshape(N, C_in, L)

        w = self._effective_weight()                                  # OIHW
        w_mat = jnp.transpose(w, (0, 2, 3, 1)).reshape(
            self.out_channel, KH * KW * C_in).astype(x_nchw.dtype)    # (Cout, Ktot)
        b2 = self.bias.astype(jnp.float32).reshape(-1, 1)             # (Cout, 1)

        out_flat = _conv2d_pallas(
            x_flat, w_mat, b2, KH=KH, KW=KW, W=W, Wr=Wr, H_out=H_out,
            left=left, base=base, head=head, tail=tail,
            strip_budget_bytes=self.strip_budget_bytes)
        # Free reshape of the NCHW-flat result back to NCHW.
        return out_flat.reshape(N, self.out_channel, H_out, W_out)


# ----------------------------------------------------------------------------
# Reference (pure lax) for correctness check.
# ----------------------------------------------------------------------------
def _reference_forward(mod, x_nchw):
    left, right, top, bottom = mod.pad
    x_pad = jnp.pad(x_nchw, ((0, 0), (0, 0), (top, bottom), (left, right)))
    w = mod._effective_weight()
    out = lax.conv_general_dilated(
        x_pad, w, window_strides=(1, 1), padding='VALID',
        dimension_numbers=('NCHW', 'OIHW', 'NCHW'))
    return out + mod.bias[None, :, None, None]


if __name__ == "__main__":
    key = jax.random.PRNGKey(0)
    kx, kp = jax.random.split(key)

    # 1) Default small config: single strip, auto-pipelined input, fused slab.
    N, C_in, H, W = 2, 4, 16, 16
    C_out, ksize = 8, 5
    x = jax.random.normal(kx, (N, C_in, H, W), jnp.float32)
    for pad_mode in ("downright", "down", "causal"):
        mod = CausalConv2dPallas(C_in, C_out, ksize, padding=pad_mode, key=kp)
        out = jax.block_until_ready(mod(x))
        ref = _reference_forward(mod, x)
        assert out.shape == ref.shape, (pad_mode, out.shape, ref.shape)
        assert jnp.allclose(out, ref, atol=1e-4, rtol=1e-4), pad_mode

    # 2) Row-strip + manual-DMA + per-tap-accumulation path (C_in >= 32),
    #    forced by a tiny strip budget (shapes still small).
    x2 = jax.random.normal(kx, (2, 48, 16, 16), jnp.float32)
    mod2 = CausalConv2dPallas(48, 32, 3, padding="downright", key=kp,
                              strip_budget_bytes=96 * 1024)
    out2 = jax.block_until_ready(mod2(x2))
    ref2 = _reference_forward(mod2, x2)
    assert out2.shape == ref2.shape
    assert jnp.allclose(out2, ref2, atol=1e-4, rtol=1e-4)

    # 3) Row-strip + manual-DMA + grouped-slab path (tiny C_in).
    mod3 = CausalConv2dPallas(C_in, C_out, ksize, padding="causal", key=kp,
                              strip_budget_bytes=96 * 1024)
    out3 = jax.block_until_ready(mod3(x))
    ref3 = _reference_forward(mod3, x)
    assert out3.shape == ref3.shape
    assert jnp.allclose(out3, ref3, atol=1e-4, rtol=1e-4)

    print("KERNEL_OK")
</pallas_src>

<mosaic_0001>
module attributes {stable_mosaic.version = 11 : i64} {
  func.func @_causal_conv_kernel(%arg0: i32, %arg1: i32, %arg2: memref<1x4x336xf32, #tpu.memory_space<vmem>>, %arg3: memref<8x100xf32, #tpu.memory_space<vmem>>, %arg4: memref<8x1xf32, #tpu.memory_space<vmem>>, %arg5: memref<1x8x256xf32, #tpu.memory_space<vmem>>, %arg6: memref<100x256xf32, #tpu.memory_space<vmem>>) attributes {dimension_semantics = [#tpu.dimension_semantics<parallel>, #tpu.dimension_semantics<parallel>], iteration_bounds = array<i64: 2, 1>, scalar_prefetch = 0 : i64, scratch_operands = 1 : i64, tpu.core_type = #tpu.core_type<tc>, window_params = [{transform_indices = @transform_0, window_bounds = array<i64: 1, 4, 336>}, {pipeline_mode = #tpu.pipeline_mode<synchronous>, transform_indices = @transform_1, window_bounds = array<i64: 8, 100>}, {pipeline_mode = #tpu.pipeline_mode<synchronous>, transform_indices = @transform_2, window_bounds = array<i64: 8, 1>}, {transform_indices = @transform_3, window_bounds = array<i64: 1, 8, 256>}]} {
    %0 = tpu.iota {dimensions = array<i32: 1>} : vector<1x256xi32>
    %c16_i32 = arith.constant 16 : i32
    %c0_i32 = arith.constant 0 : i32
    %1 = arith.cmpi eq, %c16_i32, %c0_i32 : i32
    %c1_i32 = arith.constant 1 : i32
    %2 = arith.select %1, %c1_i32, %c16_i32 : i32
    %3 = vector.broadcast %2 : i32 to vector<1x256xi32>
    %4 = arith.remsi %0, %3 : vector<1x256xi32>
    %c0_i32_0 = arith.constant 0 : i32
    %5 = vector.broadcast %c0_i32_0 : i32 to vector<1x256xi32>
    %6 = arith.cmpi ne, %4, %5 : vector<1x256xi32>
    %c0_i32_1 = arith.constant 0 : i32
    %7 = vector.broadcast %c0_i32_1 : i32 to vector<1x256xi32>
    %8 = arith.cmpi slt, %4, %7 : vector<1x256xi32>
    %c0_i32_2 = arith.constant 0 : i32
    %9 = arith.cmpi slt, %2, %c0_i32_2 : i32
    %10 = vector.broadcast %9 : i1 to vector<1x256xi1>
    %11 = vector.broadcast %10 : vector<1x256xi1> to vector<1x256xi1>
    %12 = arith.xori %8, %11 : vector<1x256xi1>
    %13 = arith.andi %12, %6 : vector<1x256xi1>
    %14 = vector.broadcast %2 : i32 to vector<1x256xi32>
    %15 = arith.addi %4, %14 : vector<1x256xi32>
    %16 = arith.select %13, %15, %4 : vector<1x256xi1>, vector<1x256xi32>
    %c-4_i32 = arith.constant -4 : i32
    %17 = vector.broadcast %c-4_i32 : i32 to vector<1x256xi32>
    %18 = arith.addi %16, %17 : vector<1x256xi32>
    %c0_i32_3 = arith.constant 0 : i32
    %19 = vector.broadcast %c0_i32_3 : i32 to vector<1x256xi32>
    %20 = arith.cmpi sge, %18, %19 : vector<1x256xi32>
    %c16_i32_4 = arith.constant 16 : i32
    %21 = vector.broadcast %c16_i32_4 : i32 to vector<1x256xi32>
    %22 = arith.cmpi slt, %18, %21 : vector<1x256xi32>
    %23 = arith.andi %20, %22 : vector<1x256xi1>
    %c-3_i32 = arith.constant -3 : i32
    %24 = vector.broadcast %c-3_i32 : i32 to vector<1x256xi32>
    %25 = arith.addi %16, %24 : vector<1x256xi32>
    %c0_i32_5 = arith.constant 0 : i32
    %26 = vector.broadcast %c0_i32_5 : i32 to vector<1x256xi32>
    %27 = arith.cmpi sge, %25, %26 : vector<1x256xi32>
    %c16_i32_6 = arith.constant 16 : i32
    %28 = vector.broadcast %c16_i32_6 : i32 to vector<1x256xi32>
    %29 = arith.cmpi slt, %25, %28 : vector<1x256xi32>
    %30 = arith.andi %27, %29 : vector<1x256xi1>
    %c-2_i32 = arith.constant -2 : i32
    %31 = vector.broadcast %c-2_i32 : i32 to vector<1x256xi32>
    %32 = arith.addi %16, %31 : vector<1x256xi32>
    %c0_i32_7 = arith.constant 0 : i32
    %33 = vector.broadcast %c0_i32_7 : i32 to vector<1x256xi32>
    %34 = arith.cmpi sge, %32, %33 : vector<1x256xi32>
    %c16_i32_8 = arith.constant 16 : i32
    %35 = vector.broadcast %c16_i32_8 : i32 to vector<1x256xi32>
    %36 = arith.cmpi slt, %32, %35 : vector<1x256xi32>
    %37 = arith.andi %34, %36 : vector<1x256xi1>
    %c-1_i32 = arith.constant -1 : i32
    %38 = vector.broadcast %c-1_i32 : i32 to vector<1x256xi32>
    %39 = arith.addi %16, %38 : vector<1x256xi32>
    %c0_i32_9 = arith.constant 0 : i32
    %40 = vector.broadcast %c0_i32_9 : i32 to vector<1x256xi32>
    %41 = arith.cmpi sge, %39, %40 : vector<1x256xi32>
    %c16_i32_10 = arith.constant 16 : i32
    %42 = vector.broadcast %c16_i32_10 : i32 to vector<1x256xi32>
    %43 = arith.cmpi slt, %39, %42 : vector<1x256xi32>
    %44 = arith.andi %41, %43 : vector<1x256xi1>
    %c0 = arith.constant 0 : index
    %c0_11 = arith.constant 0 : index
    %c12 = arith.constant 12 : index
    %45 = vector.load %arg2[%c0, %c0_11, %c12] : memref<1x4x336xf32, #tpu.memory_space<vmem>>, vector<1x4x256xf32>
    %46 = vector.shape_cast %45 : vector<1x4x256xf32> to vector<4x256xf32>
    %c0_i32_12 = arith.constant 0 : i32
    %47 = arith.sitofp %c0_i32_12 : i32 to f32
    %48 = vector.shape_cast %23 : vector<1x256xi1> to vector<1x256xi1>
    %49 = vector.broadcast %48 : vector<1x256xi1> to vector<4x256xi1>
    %50 = vector.broadcast %47 : f32 to vector<4x256xf32>
    %51 = arith.select %49, %46, %50 : vector<4x256xi1>, vector<4x256xf32>
    %c0_13 = arith.constant 0 : index
    %c0_14 = arith.constant 0 : index
    %c13 = arith.constant 13 : index
    %52 = vector.load %arg2[%c0_13, %c0_14, %c13] : memref<1x4x336xf32, #tpu.memory_space<vmem>>, vector<1x4x256xf32>
    %53 = vector.shape_cast %52 : vector<1x4x256xf32> to vector<4x256xf32>
    %c0_i32_15 = arith.constant 0 : i32
    %54 = arith.sitofp %c0_i32_15 : i32 to f32
    %55 = vector.shape_cast %30 : vector<1x256xi1> to vector<1x256xi1>
    %56 = vector.broadcast %55 : vector<1x256xi1> to vector<4x256xi1>
    %57 = vector.broadcast %54 : f32 to vector<4x256xf32>
    %58 = arith.select %56, %53, %57 : vector<4x256xi1>, vector<4x256xf32>
    %59 = tpu.concatenate %51, %58 in 0 : vector<4x256xf32>, vector<4x256xf32> -> vector<8x256xf32>
    %c0_16 = arith.constant 0 : index
    %c0_17 = arith.constant 0 : index
    %60 = vector.load %arg6[%c0_16, %c0_17] : memref<100x256xf32, #tpu.memory_space<vmem>>, vector<8x256xf32>
    tpu.vector_store %arg6[%c0_16, %c0_17], %59 {strides = array<i32>} : memref<100x256xf32, #tpu.memory_space<vmem>>, vector<8x256xf32>,
    %c0_18 = arith.constant 0 : index
    %c0_19 = arith.constant 0 : index
    %c14 = arith.constant 14 : index
    %61 = vector.load %arg2[%c0_18, %c0_19, %c14] : memref<1x4x336xf32, #tpu.memory_space<vmem>>, vector<1x4x256xf32>
    %62 = vector.shape_cast %61 : vector<1x4x256xf32> to vector<4x256xf32>
    %c0_i32_20 = arith.constant 0 : i32
    %63 = arith.sitofp %c0_i32_20 : i32 to f32
    %64 = vector.shape_cast %37 : vector<1x256xi1> to vector<1x256xi1>
    %65 = vector.broadcast %64 : vector<1x256xi1> to vector<4x256xi1>
    %66 = vector.broadcast %63 : f32 to vector<4x256xf32>
    %67 = arith.select %65, %62, %66 : vector<4x256xi1>, vector<4x256xf32>
    %c0_21 = arith.constant 0 : index
    %c0_22 = arith.constant 0 : index
    %c15 = arith.constant 15 : index
    %68 = vector.load %arg2[%c0_21, %c0_22, %c15] : memref<1x4x336xf32, #tpu.memory_space<vmem>>, vector<1x4x256xf32>
    %69 = vector.shape_cast %68 : vector<1x4x256xf32> to vector<4x256xf32>
    %c0_i32_23 = arith.constant 0 : i32
    %70 = arith.sitofp %c0_i32_23 : i32 to f32
    %71 = vector.shape_cast %44 : vector<1x256xi1> to vector<1x256xi1>
    %72 = vector.broadcast %71 : vector<1x256xi1> to vector<4x256xi1>
    %73 = vector.broadcast %70 : f32 to vector<4x256xf32>
    %74 = arith.select %72, %69, %73 : vector<4x256xi1>, vector<4x256xf32>
    %75 = tpu.concatenate %67, %74 in 0 : vector<4x256xf32>, vector<4x256xf32> -> vector<8x256xf32>
    %c8 = arith.constant 8 : index
    %c0_24 = arith.constant 0 : index
    %76 = vector.load %arg6[%c8, %c0_24] : memref<100x256xf32, #tpu.memory_space<vmem>>, vector<8x256xf32>
    tpu.vector_store %arg6[%c8, %c0_24], %75 {strides = array<i32>} : memref<100x256xf32, #tpu.memory_space<vmem>>, vector<8x256xf32>,
    %c0_25 = arith.constant 0 : index
    %c0_26 = arith.constant 0 : index
    %c16 = arith.constant 16 : index
    %77 = vector.load %arg2[%c0_25, %c0_26, %c16] : memref<1x4x336xf32, #tpu.memory_space<vmem>>, vector<1x4x256xf32>
    %78 = vector.shape_cast %77 : vector<1x4x256xf32> to vector<4x256xf32>
    %c0_27 = arith.constant 0 : index
    %c0_28 = arith.constant 0 : index
    %c28 = arith.constant 28 : index
    %79 = vector.load %arg2[%c0_27, %c0_28, %c28] : memref<1x4x336xf32, #tpu.memory_space<vmem>>, vector<1x4x256xf32>
    %80 = vector.shape_cast %79 : vector<1x4x256xf32> to vector<4x256xf32>
    %c0_i32_29 = arith.constant 0 : i32
    %81 = arith.sitofp %c0_i32_29 : i32 to f32
    %82 = vector.shape_cast %23 : vector<1x256xi1> to vector<1x256xi1>
    %83 = vector.broadcast %82 : vector<1x256xi1> to vector<4x256xi1>
    %84 = vector.broadcast %81 : f32 to vector<4x256xf32>
    %85 = arith.select %83, %80, %84 : vector<4x256xi1>, vector<4x256xf32>
    %86 = tpu.concatenate %78, %85 in 0 : vector<4x256xf32>, vector<4x256xf32> -> vector<8x256xf32>
    %c16_30 = arith.constant 16 : index
    %c0_31 = arith.constant 0 : index
    %87 = vector.load %arg6[%c16_30, %c0_31] : memref<100x256xf32, #tpu.memory_space<vmem>>, vector<8x256xf32>
    tpu.vector_store %arg6[%c16_30, %c0_31], %86 {strides = array<i32>} : memref<100x256xf32, #tpu.memory_space<vmem>>, vector<8x256xf32>,
    %c0_32 = arith.constant 0 : index
    %c0_33 = arith.constant 0 : index
    %c29 = arith.constant 29 : index
    %88 = vector.load %arg2[%c0_32, %c0_33, %c29] : memref<1x4x336xf32, #tpu.memory_space<vmem>>, vector<1x4x256xf32>
    %89 = vector.shape_cast %88 : vector<1x4x256xf32> to vector<4x256xf32>
    %c0_i32_34 = arith.constant 0 : i32
    %90 = arith.sitofp %c0_i32_34 : i32 to f32
    %91 = vector.shape_cast %30 : vector<1x256xi1> to vector<1x256xi1>
    %92 = vector.broadcast %91 : vector<1x256xi1> to vector<4x256xi1>
    %93 = vector.broadcast %90 : f32 to vector<4x256xf32>
    %94 = arith.select %92, %89, %93 : vector<4x256xi1>, vector<4x256xf32>
    %c0_35 = arith.constant 0 : index
    %c0_36 = arith.constant 0 : index
    %c30 = arith.constant 30 : index
    %95 = vector.load %arg2[%c0_35, %c0_36, %c30] : memref<1x4x336xf32, #tpu.memory_space<vmem>>, vector<1x4x256xf32>
    %96 = vector.shape_cast %95 : vector<1x4x256xf32> to vector<4x256xf32>
    %c0_i32_37 = arith.constant 0 : i32
    %97 = arith.sitofp %c0_i32_37 : i32 to f32
    %98 = vector.shape_cast %37 : vector<1x256xi1> to vector<1x256xi1>
    %99 = vector.broadcast %98 : vector<1x256xi1> to vector<4x256xi1>
    %100 = vector.broadcast %97 : f32 to vector<4x256xf32>
    %101 = arith.select %99, %96, %100 : vector<4x256xi1>, vector<4x256xf32>
    %102 = tpu.concatenate %94, %101 in 0 : vector<4x256xf32>, vector<4x256xf32> -> vector<8x256xf32>
    %c24 = arith.constant 24 : index
    %c0_38 = arith.constant 0 : index
    %103 = vector.load %arg6[%c24, %c0_38] : memref<100x256xf32, #tpu.memory_space<vmem>>, vector<8x256xf32>
    tpu.vector_store %arg6[%c24, %c0_38], %102 {strides = array<i32>} : memref<100x256xf32, #tpu.memory_space<vmem>>, vector<8x256xf32>,
    %c0_39 = arith.constant 0 : index
    %c0_40 = arith.constant 0 : index
    %c31 = arith.constant 31 : index
    %104 = vector.load %arg2[%c0_39, %c0_40, %c31] : memref<1x4x336xf32, #tpu.memory_space<vmem>>, vector<1x4x256xf32>
    %105 = vector.shape_cast %104 : vector<1x4x256xf32> to vector<4x256xf32>
    %c0_i32_41 = arith.constant 0 : i32
    %106 = arith.sitofp %c0_i32_41 : i32 to f32
    %107 = vector.shape_cast %44 : vector<1x256xi1> to vector<1x256xi1>
    %108 = vector.broadcast %107 : vector<1x256xi1> to vector<4x256xi1>
    %109 = vector.broadcast %106 : f32 to vector<4x256xf32>
    %110 = arith.select %108, %105, %109 : vector<4x256xi1>, vector<4x256xf32>
    %c0_42 = arith.constant 0 : index
    %c0_43 = arith.constant 0 : index
    %c32 = arith.constant 32 : index
    %111 = vector.load %arg2[%c0_42, %c0_43, %c32] : memref<1x4x336xf32, #tpu.memory_space<vmem>>, vector<1x4x256xf32>
    %112 = vector.shape_cast %111 : vector<1x4x256xf32> to vector<4x256xf32>
    %113 = tpu.concatenate %110, %112 in 0 : vector<4x256xf32>, vector<4x256xf32> -> vector<8x256xf32>
    %c32_44 = arith.constant 32 : index
    %c0_45 = arith.constant 0 : index
    %114 = vector.load %arg6[%c32_44, %c0_45] : memref<100x256xf32, #tpu.memory_space<vmem>>, vector<8x256xf32>
    tpu.vector_store %arg6[%c32_44, %c0_45], %113 {strides = array<i32>} : memref<100x256xf32, #tpu.memory_space<vmem>>, vector<8x256xf32>,
    %c0_46 = arith.constant 0 : index
    %c0_47 = arith.constant 0 : index
    %c44 = arith.constant 44 : index
    %115 = vector.load %arg2[%c0_46, %c0_47, %c44] : memref<1x4x336xf32, #tpu.memory_space<vmem>>, vector<1x4x256xf32>
    %116 = vector.shape_cast %115 : vector<1x4x256xf32> to vector<4x256xf32>
    %c0_i32_48 = arith.constant 0 : i32
    %117 = arith.sitofp %c0_i32_48 : i32 to f32
    %118 = vector.shape_cast %23 : vector<1x256xi1> to vector<1x256xi1>
    %119 = vector.broadcast %118 : vector<1x256xi1> to vector<4x256xi1>
    %120 = vector.broadcast %117 : f32 to vector<4x256xf32>
    %121 = arith.select %119, %116, %120 : vector<4x256xi1>, vector<4x256xf32>
    %c0_49 = arith.constant 0 : index
    %c0_50 = arith.constant 0 : index
    %c45 = arith.constant 45 : index
    %122 = vector.load %arg2[%c0_49, %c0_50, %c45] : memref<1x4x336xf32, #tpu.memory_space<vmem>>, vector<1x4x256xf32>
    %123 = vector.shape_cast %122 : vector<1x4x256xf32> to vector<4x256xf32>
    %c0_i32_51 = arith.constant 0 : i32
    %124 = arith.sitofp %c0_i32_51 : i32 to f32
    %125 = vector.shape_cast %30 : vector<1x256xi1> to vector<1x256xi1>
    %126 = vector.broadcast %125 : vector<1x256xi1> to vector<4x256xi1>
    %127 = vector.broadcast %124 : f32 to vector<4x256xf32>
    %128 = arith.select %126, %123, %127 : vector<4x256xi1>, vector<4x256xf32>
    %129 = tpu.concatenate %121, %128 in 0 : vector<4x256xf32>, vector<4x256xf32> -> vector<8x256xf32>
    %c40 = arith.constant 40 : index
    %c0_52 = arith.constant 0 : index
    %130 = vector.load %arg6[%c40, %c0_52] : memref<100x256xf32, #tpu.memory_space<vmem>>, vector<8x256xf32>
    tpu.vector_store %arg6[%c40, %c0_52], %129 {strides = array<i32>} : memref<100x256xf32, #tpu.memory_space<vmem>>, vector<8x256xf32>,
    %c0_53 = arith.constant 0 : index
    %c0_54 = arith.constant 0 : index
    %c46 = arith.constant 46 : index
    %131 = vector.load %arg2[%c0_53, %c0_54, %c46] : memref<1x4x336xf32, #tpu.memory_space<vmem>>, vector<1x4x256xf32>
    %132 = vector.shape_cast %131 : vector<1x4x256xf32> to vector<4x256xf32>
    %c0_i32_55 = arith.constant 0 : i32
    %133 = arith.sitofp %c0_i32_55 : i32 to f32
    %134 = vector.shape_cast %37 : vector<1x256xi1> to vector<1x256xi1>
    %135 = vector.broadcast %134 : vector<1x256xi1> to vector<4x256xi1>
    %136 = vector.broadcast %133 : f32 to vector<4x256xf32>
    %137 = arith.select %135, %132, %136 : vector<4x256xi1>, vector<4x256xf32>
    %c0_56 = arith.constant 0 : index
    %c0_57 = arith.constant 0 : index
    %c47 = arith.constant 47 : index
    %138 = vector.load %arg2[%c0_56, %c0_57, %c47] : memref<1x4x336xf32, #tpu.memory_space<vmem>>, vector<1x4x256xf32>
    %139 = vector.shape_cast %138 : vector<1x4x256xf32> to vector<4x256xf32>
    %c0_i32_58 = arith.constant 0 : i32
    %140 = arith.sitofp %c0_i32_58 : i32 to f32
    %141 = vector.shape_cast %44 : vector<1x256xi1> to vector<1x256xi1>
    %142 = vector.broadcast %141 : vector<1x256xi1> to vector<4x256xi1>
    %143 = vector.broadcast %140 : f32 to vector<4x256xf32>
    %144 = arith.select %142, %139, %143 : vector<4x256xi1>, vector<4x256xf32>
    %145 = tpu.concatenate %137, %144 in 0 : vector<4x256xf32>, vector<4x256xf32> -> vector<8x256xf32>
    %c48 = arith.constant 48 : index
    %c0_59 = arith.constant 0 : index
    %146 = vector.load %arg6[%c48, %c0_59] : memref<100x256xf32, #tpu.memory_space<vmem>>, vector<8x256xf32>
    tpu.vector_store %arg6[%c48, %c0_59], %145 {strides = array<i32>} : memref<100x256xf32, #tpu.memory_space<vmem>>, vector<8x256xf32>,
    %c0_60 = arith.constant 0 : index
    %c0_61 = arith.constant 0 : index
    %c48_62 = arith.constant 48 : index
    %147 = vector.load %arg2[%c0_60, %c0_61, %c48_62] : memref<1x4x336xf32, #tpu.memory_space<vmem>>, vector<1x4x256xf32>
    %148 = vector.shape_cast %147 : vector<1x4x256xf32> to vector<4x256xf32>
    %c0_63 = arith.constant 0 : index
    %c0_64 = arith.constant 0 : index
    %c60 = arith.constant 60 : index
    %149 = vector.load %arg2[%c0_63, %c0_64, %c60] : memref<1x4x336xf32, #tpu.memory_space<vmem>>, vector<1x4x256xf32>
    %150 = vector.shape_cast %149 : vector<1x4x256xf32> to vector<4x256xf32>
    %c0_i32_65 = arith.constant 0 : i32
    %151 = arith.sitofp %c0_i32_65 : i32 to f32
    %152 = vector.shape_cast %23 : vector<1x256xi1> to vector<1x256xi1>
    %153 = vector.broadcast %152 : vector<1x256xi1> to vector<4x256xi1>
    %154 = vector.broadcast %151 : f32 to vector<4x256xf32>
    %155 = arith.select %153, %150, %154 : vector<4x256xi1>, vector<4x256xf32>
    %156 = tpu.concatenate %148, %155 in 0 : vector<4x256xf32>, vector<4x256xf32> -> vector<8x256xf32>
    %c56 = arith.constant 56 : index
    %c0_66 = arith.constant 0 : index
    %157 = vector.load %arg6[%c56, %c0_66] : memref<100x256xf32, #tpu.memory_space<vmem>>, vector<8x256xf32>
    tpu.vector_store %arg6[%c56, %c0_66], %156 {strides = array<i32>} : memref<100x256xf32, #tpu.memory_space<vmem>>, vector<8x256xf32>,
    %c0_67 = arith.constant 0 : index
    %c0_68 = arith.constant 0 : index
    %c61 = arith.constant 61 : index
    %158 = vector.load %arg2[%c0_67, %c0_68, %c61] : memref<1x4x336xf32, #tpu.memory_space<vmem>>, vector<1x4x256xf32>
    %159 = vector.shape_cast %158 : vector<1x4x256xf32> to vector<4x256xf32>
    %c0_i32_69 = arith.constant 0 : i32
    %160 = arith.sitofp %c0_i32_69 : i32 to f32
    %161 = vector.shape_cast %30 : vector<1x256xi1> to vector<1x256xi1>
    %162 = vector.broadcast %161 : vector<1x256xi1> to vector<4x256xi1>
    %163 = vector.broadcast %160 : f32 to vector<4x256xf32>
    %164 = arith.select %162, %159, %163 : vector<4x256xi1>, vector<4x256xf32>
    %c0_70 = arith.constant 0 : index
    %c0_71 = arith.constant 0 : index
    %c62 = arith.constant 62 : index
    %165 = vector.load %arg2[%c0_70, %c0_71, %c62] : memref<1x4x336xf32, #tpu.memory_space<vmem>>, vector<1x4x256xf32>
    %166 = vector.shape_cast %165 : vector<1x4x256xf32> to vector<4x256xf32>
    %c0_i32_72 = arith.constant 0 : i32
    %167 = arith.sitofp %c0_i32_72 : i32 to f32
    %168 = vector.shape_cast %37 : vector<1x256xi1> to vector<1x256xi1>
    %169 = vector.broadcast %168 : vector<1x256xi1> to vector<4x256xi1>
    %170 = vector.broadcast %167 : f32 to vector<4x256xf32>
    %171 = arith.select %169, %166, %170 : vector<4x256xi1>, vector<4x256xf32>
    %172 = tpu.concatenate %164, %171 in 0 : vector<4x256xf32>, vector<4x256xf32> -> vector<8x256xf32>
    %c64 = arith.constant 64 : index
    %c0_73 = arith.constant 0 : index
    %173 = vector.load %arg6[%c64, %c0_73] : memref<100x256xf32, #tpu.memory_space<vmem>>, vector<8x256xf32>
    tpu.vector_store %arg6[%c64, %c0_73], %172 {strides = array<i32>} : memref<100x256xf32, #tpu.memory_space<vmem>>, vector<8x256xf32>,
    %c0_74 = arith.constant 0 : index
    %c0_75 = arith.constant 0 : index
    %c63 = arith.constant 63 : index
    %174 = vector.load %arg2[%c0_74, %c0_75, %c63] : memref<1x4x336xf32, #tpu.memory_space<vmem>>, vector<1x4x256xf32>
    %175 = vector.shape_cast %174 : vector<1x4x256xf32> to vector<4x256xf32>
    %c0_i32_76 = arith.constant 0 : i32
    %176 = arith.sitofp %c0_i32_76 : i32 to f32
    %177 = vector.shape_cast %44 : vector<1x256xi1> to vector<1x256xi1>
    %178 = vector.broadcast %177 : vector<1x256xi1> to vector<4x256xi1>
    %179 = vector.broadcast %176 : f32 to vector<4x256xf32>
    %180 = arith.select %178, %175, %179 : vector<4x256xi1>, vector<4x256xf32>
    %c0_77 = arith.constant 0 : index
    %c0_78 = arith.constant 0 : index
    %c64_79 = arith.constant 64 : index
    %181 = vector.load %arg2[%c0_77, %c0_78, %c64_79] : memref<1x4x336xf32, #tpu.memory_space<vmem>>, vector<1x4x256xf32>
    %182 = vector.shape_cast %181 : vector<1x4x256xf32> to vector<4x256xf32>
    %183 = tpu.concatenate %180, %182 in 0 : vector<4x256xf32>, vector<4x256xf32> -> vector<8x256xf32>
    %c72 = arith.constant 72 : index
    %c0_80 = arith.constant 0 : index
    %184 = vector.load %arg6[%c72, %c0_80] : memref<100x256xf32, #tpu.memory_space<vmem>>, vector<8x256xf32>
    tpu.vector_store %arg6[%c72, %c0_80], %183 {strides = array<i32>} : memref<100x256xf32, #tpu.memory_space<vmem>>, vector<8x256xf32>,
    %c0_81 = arith.constant 0 : index
    %c0_82 = arith.constant 0 : index
    %c76 = arith.constant 76 : index
    %185 = vector.load %arg2[%c0_81, %c0_82, %c76] : memref<1x4x336xf32, #tpu.memory_space<vmem>>, vector<1x4x256xf32>
    %186 = vector.shape_cast %185 : vector<1x4x256xf32> to vector<4x256xf32>
    %c0_i32_83 = arith.constant 0 : i32
    %187 = arith.sitofp %c0_i32_83 : i32 to f32
    %188 = vector.shape_cast %23 : vector<1x256xi1> to vector<1x256xi1>
    %189 = vector.broadcast %188 : vector<1x256xi1> to vector<4x256xi1>
    %190 = vector.broadcast %187 : f32 to vector<4x256xf32>
    %191 = arith.select %189, %186, %190 : vector<4x256xi1>, vector<4x256xf32>
    %c0_84 = arith.constant 0 : index
    %c0_85 = arith.constant 0 : index
    %c77 = arith.constant 77 : index
    %192 = vector.load %arg2[%c0_84, %c0_85, %c77] : memref<1x4x336xf32, #tpu.memory_space<vmem>>, vector<1x4x256xf32>
    %193 = vector.shape_cast %192 : vector<1x4x256xf32> to vector<4x256xf32>
    %c0_i32_86 = arith.constant 0 : i32
    %194 = arith.sitofp %c0_i32_86 : i32 to f32
    %195 = vector.shape_cast %30 : vector<1x256xi1> to vector<1x256xi1>
    %196 = vector.broadcast %195 : vector<1x256xi1> to vector<4x256xi1>
    %197 = vector.broadcast %194 : f32 to vector<4x256xf32>
    %198 = arith.select %196, %193, %197 : vector<4x256xi1>, vector<4x256xf32>
    %199 = tpu.concatenate %191, %198 in 0 : vector<4x256xf32>, vector<4x256xf32> -> vector<8x256xf32>
    %c80 = arith.constant 80 : index
    %c0_87 = arith.constant 0 : index
    %200 = vector.load %arg6[%c80, %c0_87] : memref<100x256xf32, #tpu.memory_space<vmem>>, vector<8x256xf32>
    tpu.vector_store %arg6[%c80, %c0_87], %199 {strides = array<i32>} : memref<100x256xf32, #tpu.memory_space<vmem>>, vector<8x256xf32>,
    %c0_88 = arith.constant 0 : index
    %c0_89 = arith.constant 0 : index
    %c78 = arith.constant 78 : index
    %201 = vector.load %arg2[%c0_88, %c0_89, %c78] : memref<1x4x336xf32, #tpu.memory_space<vmem>>, vector<1x4x256xf32>
    %202 = vector.shape_cast %201 : vector<1x4x256xf32> to vector<4x256xf32>
    %c0_i32_90 = arith.constant 0 : i32
    %203 = arith.sitofp %c0_i32_90 : i32 to f32
    %204 = vector.shape_cast %37 : vector<1x256xi1> to vector<1x256xi1>
    %205 = vector.broadcast %204 : vector<1x256xi1> to vector<4x256xi1>
    %206 = vector.broadcast %203 : f32 to vector<4x256xf32>
    %207 = arith.select %205, %202, %206 : vector<4x256xi1>, vector<4x256xf32>
    %c0_91 = arith.constant 0 : index
    %c0_92 = arith.constant 0 : index
    %c79 = arith.constant 79 : index
    %208 = vector.load %arg2[%c0_91, %c0_92, %c79] : memref<1x4x336xf32, #tpu.memory_space<vmem>>, vector<1x4x256xf32>
    %209 = vector.shape_cast %208 : vector<1x4x256xf32> to vector<4x256xf32>
    %c0_i32_93 = arith.constant 0 : i32
    %210 = arith.sitofp %c0_i32_93 : i32 to f32
    %211 = vector.shape_cast %44 : vector<1x256xi1> to vector<1x256xi1>
    %212 = vector.broadcast %211 : vector<1x256xi1> to vector<4x256xi1>
    %213 = vector.broadcast %210 : f32 to vector<4x256xf32>
    %214 = arith.select %212, %209, %213 : vector<4x256xi1>, vector<4x256xf32>
    %215 = tpu.concatenate %207, %214 in 0 : vector<4x256xf32>, vector<4x256xf32> -> vector<8x256xf32>
    %c88 = arith.constant 88 : index
    %c0_94 = arith.constant 0 : index
    %216 = vector.load %arg6[%c88, %c0_94] : memref<100x256xf32, #tpu.memory_space<vmem>>, vector<8x256xf32>
    tpu.vector_store %arg6[%c88, %c0_94], %215 {strides = array<i32>} : memref<100x256xf32, #tpu.memory_space<vmem>>, vector<8x256xf32>,
    %c0_95 = arith.constant 0 : index
    %c0_96 = arith.constant 0 : index
    %c80_97 = arith.constant 80 : index
    %217 = vector.load %arg2[%c0_95, %c0_96, %c80_97] : memref<1x4x336xf32, #tpu.memory_space<vmem>>, vector<1x4x256xf32>
    %218 = vector.shape_cast %217 : vector<1x4x256xf32> to vector<4x256xf32>
    %c96 = arith.constant 96 : index
    %c0_98 = arith.constant 0 : index
    %219 = vector.load %arg6[%c96, %c0_98] : memref<100x256xf32, #tpu.memory_space<vmem>>, vector<4x256xf32>
    tpu.vector_store %arg6[%c96, %c0_98], %218 {strides = array<i32>} : memref<100x256xf32, #tpu.memory_space<vmem>>, vector<4x256xf32>,
    %c0_99 = arith.constant 0 : index
    %c0_100 = arith.constant 0 : index
    %220 = vector.load %arg3[%c0_99, %c0_100] : memref<8x100xf32, #tpu.memory_space<vmem>>, vector<8x100xf32>
    %c0_101 = arith.constant 0 : index
    %c0_102 = arith.constant 0 : index
    %221 = vector.load %arg6[%c0_101, %c0_102] : memref<100x256xf32, #tpu.memory_space<vmem>>, vector<100x256xf32>
    %cst = arith.constant dense<0.000000e+00> : vector<8x256xf32>
    %222 = tpu.matmul %220, %221, %cst {dimension_numbers = #tpu.dot_dimension_numbers<[1], [0], [0], [1], [0, 0, 1, 1], [], []>} : vector<8x100xf32>, vector<100x256xf32>, vector<8x256xf32> -> vector<8x256xf32>
    %c0_103 = arith.constant 0 : index
    %c0_104 = arith.constant 0 : index
    %223 = vector.load %arg4[%c0_103, %c0_104] : memref<8x1xf32, #tpu.memory_space<vmem>>, vector<8x1xf32>
    %224 = vector.broadcast %223 : vector<8x1xf32> to vector<8x256xf32>
    %225 = arith.addf %222, %224 : vector<8x256xf32>
    %c0_105 = arith.constant 0 : index
    %c0_106 = arith.constant 0 : index
    %c0_107 = arith.constant 0 : index
    %226 = vector.load %arg5[%c0_105, %c0_106, %c0_107] : memref<1x8x256xf32, #tpu.memory_space<vmem>>, vector<1x8x256xf32>
    %227 = vector.shape_cast %226 : vector<1x8x256xf32> to vector<8x256xf32>
    %228 = vector.shape_cast %225 : vector<8x256xf32> to vector<1x8x256xf32>
    tpu.vector_store %arg5[%c0_105, %c0_106, %c0_107], %228 {strides = array<i32>} : memref<1x8x256xf32, #tpu.memory_space<vmem>>, vector<1x8x256xf32>,
    return
  }
  func.func @transform_0(%arg0: i32, %arg1: i32) -> (i32, i32, i32) {
    %c0_i32 = arith.constant 0 : i32
    %c0_i32_0 = arith.constant 0 : i32
    %c0_i32_1 = arith.constant 0 : i32
    return %arg0, %c0_i32, %c0_i32_0 : i32, i32, i32
  }
  func.func @transform_1(%arg0: i32, %arg1: i32) -> (i32, i32) {
    %c0_i32 = arith.constant 0 : i32
    %c0_i32_0 = arith.constant 0 : i32
    %c0_i32_1 = arith.constant 0 : i32
    return %c0_i32, %c0_i32_0 : i32, i32
  }
  func.func @transform_2(%arg0: i32, %arg1: i32) -> (i32, i32) {
    %c0_i32 = arith.constant 0 : i32
    %c0_i32_0 = arith.constant 0 : i32
    %c0_i32_1 = arith.constant 0 : i32
    return %c0_i32, %c0_i32_0 : i32, i32
  }
  func.func @transform_3(%arg0: i32, %arg1: i32) -> (i32, i32, i32) {
    %c0_i32 = arith.constant 0 : i32
    %c0_i32_0 = arith.constant 0 : i32
    return %arg0, %c0_i32, %arg1 : i32, i32, i32
  }
}

module attributes {stable_mosaic.version = 11 : i64} {
  func.func @_causal_conv_kernel(%arg0: i32, %arg1: i32, %arg2: memref<1x4x336xf32, #tpu.memory_space<vmem>>, %arg3: memref<8x100xf32, #tpu.memory_space<vmem>>, %arg4: memref<8x1xf32, #tpu.memory_space<vmem>>, %arg5: memref<1x8x256xf32, #tpu.memory_space<vmem>>, %arg6: memref<100x256xf32, #tpu.memory_space<vmem>>) attributes {dimension_semantics = [#tpu.dimension_semantics<parallel>, #tpu.dimension_semantics<parallel>], iteration_bounds = array<i64: 2, 1>, scalar_prefetch = 0 : i64, scratch_operands = 1 : i64, tpu.core_type = #tpu.core_type<tc>, window_params = [{transform_indices = @transform_0, window_bounds = array<i64: 1, 4, 336>}, {pipeline_mode = #tpu.pipeline_mode<synchronous>, transform_indices = @transform_1, window_bounds = array<i64: 8, 100>}, {pipeline_mode = #tpu.pipeline_mode<synchronous>, transform_indices = @transform_2, window_bounds = array<i64: 8, 1>}, {transform_indices = @transform_3, window_bounds = array<i64: 1, 8, 256>}]} {
    %0 = tpu.iota {dimensions = array<i32: 1>} : vector<1x256xi32>
    %c16_i32 = arith.constant 16 : i32
    %c0_i32 = arith.constant 0 : i32
    %1 = arith.cmpi eq, %c16_i32, %c0_i32 : i32
    %c1_i32 = arith.constant 1 : i32
    %2 = arith.select %1, %c1_i32, %c16_i32 : i32
    %3 = vector.broadcast %2 : i32 to vector<1x256xi32>
    %4 = arith.remsi %0, %3 : vector<1x256xi32>
    %c0_i32_0 = arith.constant 0 : i32
    %5 = vector.broadcast %c0_i32_0 : i32 to vector<1x256xi32>
    %6 = arith.cmpi ne, %4, %5 : vector<1x256xi32>
    %c0_i32_1 = arith.constant 0 : i32
    %7 = vector.broadcast %c0_i32_1 : i32 to vector<1x256xi32>
    %8 = arith.cmpi slt, %4, %7 : vector<1x256xi32>
    %c0_i32_2 = arith.constant 0 : i32
    %9 = arith.cmpi slt, %2, %c0_i32_2 : i32
    %10 = vector.broadcast %9 : i1 to vector<1x256xi1>
    %11 = vector.broadcast %10 : vector<1x256xi1> to vector<1x256xi1>
    %12 = arith.xori %8, %11 : vector<1x256xi1>
    %13 = arith.andi %12, %6 : vector<1x256xi1>
    %14 = vector.broadcast %2 : i32 to vector<1x256xi32>
    %15 = arith.addi %4, %14 : vector<1x256xi32>
    %16 = arith.select %13, %15, %4 : vector<1x256xi1>, vector<1x256xi32>
    %c-4_i32 = arith.constant -4 : i32
    %17 = vector.broadcast %c-4_i32 : i32 to vector<1x256xi32>
    %18 = arith.addi %16, %17 : vector<1x256xi32>
    %c0_i32_3 = arith.constant 0 : i32
    %19 = vector.broadcast %c0_i32_3 : i32 to vector<1x256xi32>
    %20 = arith.cmpi sge, %18, %19 : vector<1x256xi32>
    %c16_i32_4 = arith.constant 16 : i32
    %21 = vector.broadcast %c16_i32_4 : i32 to vector<1x256xi32>
    %22 = arith.cmpi slt, %18, %21 : vector<1x256xi32>
    %23 = arith.andi %20, %22 : vector<1x256xi1>
    %c-3_i32 = arith.constant -3 : i32
    %24 = vector.broadcast %c-3_i32 : i32 to vector<1x256xi32>
    %25 = arith.addi %16, %24 : vector<1x256xi32>
    %c0_i32_5 = arith.constant 0 : i32
    %26 = vector.broadcast %c0_i32_5 : i32 to vector<1x256xi32>
    %27 = arith.cmpi sge, %25, %26 : vector<1x256xi32>
    %c16_i32_6 = arith.constant 16 : i32
    %28 = vector.broadcast %c16_i32_6 : i32 to vector<1x256xi32>
    %29 = arith.cmpi slt, %25, %28 : vector<1x256xi32>
    %30 = arith.andi %27, %29 : vector<1x256xi1>
    %c-2_i32 = arith.constant -2 : i32
    %31 = vector.broadcast %c-2_i32 : i32 to vector<1x256xi32>
    %32 = arith.addi %16, %31 : vector<1x256xi32>
    %c0_i32_7 = arith.constant 0 : i32
    %33 = vector.broadcast %c0_i32_7 : i32 to vector<1x256xi32>
    %34 = arith.cmpi sge, %32, %33 : vector<1x256xi32>
    %c16_i32_8 = arith.constant 16 : i32
    %35 = vector.broadcast %c16_i32_8 : i32 to vector<1x256xi32>
    %36 = arith.cmpi slt, %32, %35 : vector<1x256xi32>
    %37 = arith.andi %34, %36 : vector<1x256xi1>
    %c-1_i32 = arith.constant -1 : i32
    %38 = vector.broadcast %c-1_i32 : i32 to vector<1x256xi32>
    %39 = arith.addi %16, %38 : vector<1x256xi32>
    %c0_i32_9 = arith.constant 0 : i32
    %40 = vector.broadcast %c0_i32_9 : i32 to vector<1x256xi32>
    %41 = arith.cmpi sge, %39, %40 : vector<1x256xi32>
    %c16_i32_10 = arith.constant 16 : i32
    %42 = vector.broadcast %c16_i32_10 : i32 to vector<1x256xi32>
    %43 = arith.cmpi slt, %39, %42 : vector<1x256xi32>
    %44 = arith.andi %41, %43 : vector<1x256xi1>
    %c0 = arith.constant 0 : index
    %c0_11 = arith.constant 0 : index
    %c12 = arith.constant 12 : index
    %45 = vector.load %arg2[%c0, %c0_11, %c12] : memref<1x4x336xf32, #tpu.memory_space<vmem>>, vector<1x4x256xf32>
    %46 = vector.shape_cast %45 : vector<1x4x256xf32> to vector<4x256xf32>
    %c0_i32_12 = arith.constant 0 : i32
    %47 = arith.sitofp %c0_i32_12 : i32 to f32
    %48 = vector.shape_cast %23 : vector<1x256xi1> to vector<1x256xi1>
    %49 = vector.broadcast %48 : vector<1x256xi1> to vector<4x256xi1>
    %50 = vector.broadcast %47 : f32 to vector<4x256xf32>
    %51 = arith.select %49, %46, %50 : vector<4x256xi1>, vector<4x256xf32>
    %c0_13 = arith.constant 0 : index
    %c0_14 = arith.constant 0 : index
    %c13 = arith.constant 13 : index
    %52 = vector.load %arg2[%c0_13, %c0_14, %c13] : memref<1x4x336xf32, #tpu.memory_space<vmem>>, vector<1x4x256xf32>
    %53 = vector.shape_cast %52 : vector<1x4x256xf32> to vector<4x256xf32>
    %c0_i32_15 = arith.constant 0 : i32
    %54 = arith.sitofp %c0_i32_15 : i32 to f32
    %55 = vector.shape_cast %30 : vector<1x256xi1> to vector<1x256xi1>
    %56 = vector.broadcast %55 : vector<1x256xi1> to vector<4x256xi1>
    %57 = vector.broadcast %54 : f32 to vector<4x256xf32>
    %58 = arith.select %56, %53, %57 : vector<4x256xi1>, vector<4x256xf32>
    %59 = tpu.concatenate %51, %58 in 0 : vector<4x256xf32>, vector<4x256xf32> -> vector<8x256xf32>
    %c0_16 = arith.constant 0 : index
    %c0_17 = arith.constant 0 : index
    %60 = vector.load %arg6[%c0_16, %c0_17] : memref<100x256xf32, #tpu.memory_space<vmem>>, vector<8x256xf32>
    tpu.vector_store %arg6[%c0_16, %c0_17], %59 {strides = array<i32>} : memref<100x256xf32, #tpu.memory_space<vmem>>, vector<8x256xf32>,
    %c0_18 = arith.constant 0 : index
    %c0_19 = arith.constant 0 : index
    %c14 = arith.constant 14 : index
    %61 = vector.load %arg2[%c0_18, %c0_19, %c14] : memref<1x4x336xf32, #tpu.memory_space<vmem>>, vector<1x4x256xf32>
    %62 = vector.shape_cast %61 : vector<1x4x256xf32> to vector<4x256xf32>
    %c0_i32_20 = arith.constant 0 : i32
    %63 = arith.sitofp %c0_i32_20 : i32 to f32
    %64 = vector.shape_cast %37 : vector<1x256xi1> to vector<1x256xi1>
    %65 = vector.broadcast %64 : vector<1x256xi1> to vector<4x256xi1>
    %66 = vector.broadcast %63 : f32 to vector<4x256xf32>
    %67 = arith.select %65, %62, %66 : vector<4x256xi1>, vector<4x256xf32>
    %c0_21 = arith.constant 0 : index
    %c0_22 = arith.constant 0 : index
    %c15 = arith.constant 15 : index
    %68 = vector.load %arg2[%c0_21, %c0_22, %c15] : memref<1x4x336xf32, #tpu.memory_space<vmem>>, vector<1x4x256xf32>
    %69 = vector.shape_cast %68 : vector<1x4x256xf32> to vector<4x256xf32>
    %c0_i32_23 = arith.constant 0 : i32
    %70 = arith.sitofp %c0_i32_23 : i32 to f32
    %71 = vector.shape_cast %44 : vector<1x256xi1> to vector<1x256xi1>
    %72 = vector.broadcast %71 : vector<1x256xi1> to vector<4x256xi1>
    %73 = vector.broadcast %70 : f32 to vector<4x256xf32>
    %74 = arith.select %72, %69, %73 : vector<4x256xi1>, vector<4x256xf32>
    %75 = tpu.concatenate %67, %74 in 0 : vector<4x256xf32>, vector<4x256xf32> -> vector<8x256xf32>
    %c8 = arith.constant 8 : index
    %c0_24 = arith.constant 0 : index
    %76 = vector.load %arg6[%c8, %c0_24] : memref<100x256xf32, #tpu.memory_space<vmem>>, vector<8x256xf32>
    tpu.vector_store %arg6[%c8, %c0_24], %75 {strides = array<i32>} : memref<100x256xf32, #tpu.memory_space<vmem>>, vector<8x256xf32>,
    %c0_25 = arith.constant 0 : index
    %c0_26 = arith.constant 0 : index
    %c16 = arith.constant 16 : index
    %77 = vector.load %arg2[%c0_25, %c0_26, %c16] : memref<1x4x336xf32, #tpu.memory_space<vmem>>, vector<1x4x256xf32>
    %78 = vector.shape_cast %77 : vector<1x4x256xf32> to vector<4x256xf32>
    %c0_27 = arith.constant 0 : index
    %c0_28 = arith.constant 0 : index
    %c28 = arith.constant 28 : index
    %79 = vector.load %arg2[%c0_27, %c0_28, %c28] : memref<1x4x336xf32, #tpu.memory_space<vmem>>, vector<1x4x256xf32>
    %80 = vector.shape_cast %79 : vector<1x4x256xf32> to vector<4x256xf32>
    %c0_i32_29 = arith.constant 0 : i32
    %81 = arith.sitofp %c0_i32_29 : i32 to f32
    %82 = vector.shape_cast %23 : vector<1x256xi1> to vector<1x256xi1>
    %83 = vector.broadcast %82 : vector<1x256xi1> to vector<4x256xi1>
    %84 = vector.broadcast %81 : f32 to vector<4x256xf32>
    %85 = arith.select %83, %80, %84 : vector<4x256xi1>, vector<4x256xf32>
    %86 = tpu.concatenate %78, %85 in 0 : vector<4x256xf32>, vector<4x256xf32> -> vector<8x256xf32>
    %c16_30 = arith.constant 16 : index
    %c0_31 = arith.constant 0 : index
    %87 = vector.load %arg6[%c16_30, %c0_31] : memref<100x256xf32, #tpu.memory_space<vmem>>, vector<8x256xf32>
    tpu.vector_store %arg6[%c16_30, %c0_31], %86 {strides = array<i32>} : memref<100x256xf32, #tpu.memory_space<vmem>>, vector<8x256xf32>,
    %c0_32 = arith.constant 0 : index
    %c0_33 = arith.constant 0 : index
    %c29 = arith.constant 29 : index
    %88 = vector.load %arg2[%c0_32, %c0_33, %c29] : memref<1x4x336xf32, #tpu.memory_space<vmem>>, vector<1x4x256xf32>
    %89 = vector.shape_cast %88 : vector<1x4x256xf32> to vector<4x256xf32>
    %c0_i32_34 = arith.constant 0 : i32
    %90 = arith.sitofp %c0_i32_34 : i32 to f32
    %91 = vector.shape_cast %30 : vector<1x256xi1> to vector<1x256xi1>
    %92 = vector.broadcast %91 : vector<1x256xi1> to vector<4x256xi1>
    %93 = vector.broadcast %90 : f32 to vector<4x256xf32>
    %94 = arith.select %92, %89, %93 : vector<4x256xi1>, vector<4x256xf32>
    %c0_35 = arith.constant 0 : index
    %c0_36 = arith.constant 0 : index
    %c30 = arith.constant 30 : index
    %95 = vector.load %arg2[%c0_35, %c0_36, %c30] : memref<1x4x336xf32, #tpu.memory_space<vmem>>, vector<1x4x256xf32>
    %96 = vector.shape_cast %95 : vector<1x4x256xf32> to vector<4x256xf32>
    %c0_i32_37 = arith.constant 0 : i32
    %97 = arith.sitofp %c0_i32_37 : i32 to f32
    %98 = vector.shape_cast %37 : vector<1x256xi1> to vector<1x256xi1>
    %99 = vector.broadcast %98 : vector<1x256xi1> to vector<4x256xi1>
    %100 = vector.broadcast %97 : f32 to vector<4x256xf32>
    %101 = arith.select %99, %96, %100 : vector<4x256xi1>, vector<4x256xf32>
    %102 = tpu.concatenate %94, %101 in 0 : vector<4x256xf32>, vector<4x256xf32> -> vector<8x256xf32>
    %c24 = arith.constant 24 : index
    %c0_38 = arith.constant 0 : index
    %103 = vector.load %arg6[%c24, %c0_38] : memref<100x256xf32, #tpu.memory_space<vmem>>, vector<8x256xf32>
    tpu.vector_store %arg6[%c24, %c0_38], %102 {strides = array<i32>} : memref<100x256xf32, #tpu.memory_space<vmem>>, vector<8x256xf32>,
    %c0_39 = arith.constant 0 : index
    %c0_40 = arith.constant 0 : index
    %c31 = arith.constant 31 : index
    %104 = vector.load %arg2[%c0_39, %c0_40, %c31] : memref<1x4x336xf32, #tpu.memory_space<vmem>>, vector<1x4x256xf32>
    %105 = vector.shape_cast %104 : vector<1x4x256xf32> to vector<4x256xf32>
    %c0_i32_41 = arith.constant 0 : i32
    %106 = arith.sitofp %c0_i32_41 : i32 to f32
    %107 = vector.shape_cast %44 : vector<1x256xi1> to vector<1x256xi1>
    %108 = vector.broadcast %107 : vector<1x256xi1> to vector<4x256xi1>
    %109 = vector.broadcast %106 : f32 to vector<4x256xf32>
    %110 = arith.select %108, %105, %109 : vector<4x256xi1>, vector<4x256xf32>
    %c0_42 = arith.constant 0 : index
    %c0_43 = arith.constant 0 : index
    %c32 = arith.constant 32 : index
    %111 = vector.load %arg2[%c0_42, %c0_43, %c32] : memref<1x4x336xf32, #tpu.memory_space<vmem>>, vector<1x4x256xf32>
    %112 = vector.shape_cast %111 : vector<1x4x256xf32> to vector<4x256xf32>
    %113 = tpu.concatenate %110, %112 in 0 : vector<4x256xf32>, vector<4x256xf32> -> vector<8x256xf32>
    %c32_44 = arith.constant 32 : index
    %c0_45 = arith.constant 0 : index
    %114 = vector.load %arg6[%c32_44, %c0_45] : memref<100x256xf32, #tpu.memory_space<vmem>>, vector<8x256xf32>
    tpu.vector_store %arg6[%c32_44, %c0_45], %113 {strides = array<i32>} : memref<100x256xf32, #tpu.memory_space<vmem>>, vector<8x256xf32>,
    %c0_46 = arith.constant 0 : index
    %c0_47 = arith.constant 0 : index
    %c44 = arith.constant 44 : index
    %115 = vector.load %arg2[%c0_46, %c0_47, %c44] : memref<1x4x336xf32, #tpu.memory_space<vmem>>, vector<1x4x256xf32>
    %116 = vector.shape_cast %115 : vector<1x4x256xf32> to vector<4x256xf32>
    %c0_i32_48 = arith.constant 0 : i32
    %117 = arith.sitofp %c0_i32_48 : i32 to f32
    %118 = vector.shape_cast %23 : vector<1x256xi1> to vector<1x256xi1>
    %119 = vector.broadcast %118 : vector<1x256xi1> to vector<4x256xi1>
    %120 = vector.broadcast %117 : f32 to vector<4x256xf32>
    %121 = arith.select %119, %116, %120 : vector<4x256xi1>, vector<4x256xf32>
    %c0_49 = arith.constant 0 : index
    %c0_50 = arith.constant 0 : index
    %c45 = arith.constant 45 : index
    %122 = vector.load %arg2[%c0_49, %c0_50, %c45] : memref<1x4x336xf32, #tpu.memory_space<vmem>>, vector<1x4x256xf32>
    %123 = vector.shape_cast %122 : vector<1x4x256xf32> to vector<4x256xf32>
    %c0_i32_51 = arith.constant 0 : i32
    %124 = arith.sitofp %c0_i32_51 : i32 to f32
    %125 = vector.shape_cast %30 : vector<1x256xi1> to vector<1x256xi1>
    %126 = vector.broadcast %125 : vector<1x256xi1> to vector<4x256xi1>
    %127 = vector.broadcast %124 : f32 to vector<4x256xf32>
    %128 = arith.select %126, %123, %127 : vector<4x256xi1>, vector<4x256xf32>
    %129 = tpu.concatenate %121, %128 in 0 : vector<4x256xf32>, vector<4x256xf32> -> vector<8x256xf32>
    %c40 = arith.constant 40 : index
    %c0_52 = arith.constant 0 : index
    %130 = vector.load %arg6[%c40, %c0_52] : memref<100x256xf32, #tpu.memory_space<vmem>>, vector<8x256xf32>
    tpu.vector_store %arg6[%c40, %c0_52], %129 {strides = array<i32>} : memref<100x256xf32, #tpu.memory_space<vmem>>, vector<8x256xf32>,
    %c0_53 = arith.constant 0 : index
    %c0_54 = arith.constant 0 : index
    %c46 = arith.constant 46 : index
    %131 = vector.load %arg2[%c0_53, %c0_54, %c46] : memref<1x4x336xf32, #tpu.memory_space<vmem>>, vector<1x4x256xf32>
    %132 = vector.shape_cast %131 : vector<1x4x256xf32> to vector<4x256xf32>
    %c0_i32_55 = arith.constant 0 : i32
    %133 = arith.sitofp %c0_i32_55 : i32 to f32
    %134 = vector.shape_cast %37 : vector<1x256xi1> to vector<1x256xi1>
    %135 = vector.broadcast %134 : vector<1x256xi1> to vector<4x256xi1>
    %136 = vector.broadcast %133 : f32 to vector<4x256xf32>
    %137 = arith.select %135, %132, %136 : vector<4x256xi1>, vector<4x256xf32>
    %c0_56 = arith.constant 0 : index
    %c0_57 = arith.constant 0 : index
    %c47 = arith.constant 47 : index
    %138 = vector.load %arg2[%c0_56, %c0_57, %c47] : memref<1x4x336xf32, #tpu.memory_space<vmem>>, vector<1x4x256xf32>
    %139 = vector.shape_cast %138 : vector<1x4x256xf32> to vector<4x256xf32>
    %c0_i32_58 = arith.constant 0 : i32
    %140 = arith.sitofp %c0_i32_58 : i32 to f32
    %141 = vector.shape_cast %44 : vector<1x256xi1> to vector<1x256xi1>
    %142 = vector.broadcast %141 : vector<1x256xi1> to vector<4x256xi1>
    %143 = vector.broadcast %140 : f32 to vector<4x256xf32>
    %144 = arith.select %142, %139, %143 : vector<4x256xi1>, vector<4x256xf32>
    %145 = tpu.concatenate %137, %144 in 0 : vector<4x256xf32>, vector<4x256xf32> -> vector<8x256xf32>
    %c48 = arith.constant 48 : index
    %c0_59 = arith.constant 0 : index
    %146 = vector.load %arg6[%c48, %c0_59] : memref<100x256xf32, #tpu.memory_space<vmem>>, vector<8x256xf32>
    tpu.vector_store %arg6[%c48, %c0_59], %145 {strides = array<i32>} : memref<100x256xf32, #tpu.memory_space<vmem>>, vector<8x256xf32>,
    %c0_60 = arith.constant 0 : index
    %c0_61 = arith.constant 0 : index
    %c48_62 = arith.constant 48 : index
    %147 = vector.load %arg2[%c0_60, %c0_61, %c48_62] : memref<1x4x336xf32, #tpu.memory_space<vmem>>, vector<1x4x256xf32>
    %148 = vector.shape_cast %147 : vector<1x4x256xf32> to vector<4x256xf32>
    %c0_63 = arith.constant 0 : index
    %c0_64 = arith.constant 0 : index
    %c60 = arith.constant 60 : index
    %149 = vector.load %arg2[%c0_63, %c0_64, %c60] : memref<1x4x336xf32, #tpu.memory_space<vmem>>, vector<1x4x256xf32>
    %150 = vector.shape_cast %149 : vector<1x4x256xf32> to vector<4x256xf32>
    %c0_i32_65 = arith.constant 0 : i32
    %151 = arith.sitofp %c0_i32_65 : i32 to f32
    %152 = vector.shape_cast %23 : vector<1x256xi1> to vector<1x256xi1>
    %153 = vector.broadcast %152 : vector<1x256xi1> to vector<4x256xi1>
    %154 = vector.broadcast %151 : f32 to vector<4x256xf32>
    %155 = arith.select %153, %150, %154 : vector<4x256xi1>, vector<4x256xf32>
    %156 = tpu.concatenate %148, %155 in 0 : vector<4x256xf32>, vector<4x256xf32> -> vector<8x256xf32>
    %c56 = arith.constant 56 : index
    %c0_66 = arith.constant 0 : index
    %157 = vector.load %arg6[%c56, %c0_66] : memref<100x256xf32, #tpu.memory_space<vmem>>, vector<8x256xf32>
    tpu.vector_store %arg6[%c56, %c0_66], %156 {strides = array<i32>} : memref<100x256xf32, #tpu.memory_space<vmem>>, vector<8x256xf32>,
    %c0_67 = arith.constant 0 : index
    %c0_68 = arith.constant 0 : index
    %c61 = arith.constant 61 : index
    %158 = vector.load %arg2[%c0_67, %c0_68, %c61] : memref<1x4x336xf32, #tpu.memory_space<vmem>>, vector<1x4x256xf32>
    %159 = vector.shape_cast %158 : vector<1x4x256xf32> to vector<4x256xf32>
    %c0_i32_69 = arith.constant 0 : i32
    %160 = arith.sitofp %c0_i32_69 : i32 to f32
    %161 = vector.shape_cast %30 : vector<1x256xi1> to vector<1x256xi1>
    %162 = vector.broadcast %161 : vector<1x256xi1> to vector<4x256xi1>
    %163 = vector.broadcast %160 : f32 to vector<4x256xf32>
    %164 = arith.select %162, %159, %163 : vector<4x256xi1>, vector<4x256xf32>
    %c0_70 = arith.constant 0 : index
    %c0_71 = arith.constant 0 : index
    %c62 = arith.constant 62 : index
    %165 = vector.load %arg2[%c0_70, %c0_71, %c62] : memref<1x4x336xf32, #tpu.memory_space<vmem>>, vector<1x4x256xf32>
    %166 = vector.shape_cast %165 : vector<1x4x256xf32> to vector<4x256xf32>
    %c0_i32_72 = arith.constant 0 : i32
    %167 = arith.sitofp %c0_i32_72 : i32 to f32
    %168 = vector.shape_cast %37 : vector<1x256xi1> to vector<1x256xi1>
    %169 = vector.broadcast %168 : vector<1x256xi1> to vector<4x256xi1>
    %170 = vector.broadcast %167 : f32 to vector<4x256xf32>
    %171 = arith.select %169, %166, %170 : vector<4x256xi1>, vector<4x256xf32>
    %172 = tpu.concatenate %164, %171 in 0 : vector<4x256xf32>, vector<4x256xf32> -> vector<8x256xf32>
    %c64 = arith.constant 64 : index
    %c0_73 = arith.constant 0 : index
    %173 = vector.load %arg6[%c64, %c0_73] : memref<100x256xf32, #tpu.memory_space<vmem>>, vector<8x256xf32>
    tpu.vector_store %arg6[%c64, %c0_73], %172 {strides = array<i32>} : memref<100x256xf32, #tpu.memory_space<vmem>>, vector<8x256xf32>,
    %c0_74 = arith.constant 0 : index
    %c0_75 = arith.constant 0 : index
    %c63 = arith.constant 63 : index
    %174 = vector.load %arg2[%c0_74, %c0_75, %c63] : memref<1x4x336xf32, #tpu.memory_space<vmem>>, vector<1x4x256xf32>
    %175 = vector.shape_cast %174 : vector<1x4x256xf32> to vector<4x256xf32>
    %c0_i32_76 = arith.constant 0 : i32
    %176 = arith.sitofp %c0_i32_76 : i32 to f32
    %177 = vector.shape_cast %44 : vector<1x256xi1> to vector<1x256xi1>
    %178 = vector.broadcast %177 : vector<1x256xi1> to vector<4x256xi1>
    %179 = vector.broadcast %176 : f32 to vector<4x256xf32>
    %180 = arith.select %178, %175, %179 : vector<4x256xi1>, vector<4x256xf32>
    %c0_77 = arith.constant 0 : index
    %c0_78 = arith.constant 0 : index
    %c64_79 = arith.constant 64 : index
    %181 = vector.load %arg2[%c0_77, %c0_78, %c64_79] : memref<1x4x336xf32, #tpu.memory_space<vmem>>, vector<1x4x256xf32>
    %182 = vector.shape_cast %181 : vector<1x4x256xf32> to vector<4x256xf32>
    %183 = tpu.concatenate %180, %182 in 0 : vector<4x256xf32>, vector<4x256xf32> -> vector<8x256xf32>
    %c72 = arith.constant 72 : index
    %c0_80 = arith.constant 0 : index
    %184 = vector.load %arg6[%c72, %c0_80] : memref<100x256xf32, #tpu.memory_space<vmem>>, vector<8x256xf32>
    tpu.vector_store %arg6[%c72, %c0_80], %183 {strides = array<i32>} : memref<100x256xf32, #tpu.memory_space<vmem>>, vector<8x256xf32>,
    %c0_81 = arith.constant 0 : index
    %c0_82 = arith.constant 0 : index
    %c76 = arith.constant 76 : index
    %185 = vector.load %arg2[%c0_81, %c0_82, %c76] : memref<1x4x336xf32, #tpu.memory_space<vmem>>, vector<1x4x256xf32>
    %186 = vector.shape_cast %185 : vector<1x4x256xf32> to vector<4x256xf32>
    %c0_i32_83 = arith.constant 0 : i32
    %187 = arith.sitofp %c0_i32_83 : i32 to f32
    %188 = vector.shape_cast %23 : vector<1x256xi1> to vector<1x256xi1>
    %189 = vector.broadcast %188 : vector<1x256xi1> to vector<4x256xi1>
    %190 = vector.broadcast %187 : f32 to vector<4x256xf32>
    %191 = arith.select %189, %186, %190 : vector<4x256xi1>, vector<4x256xf32>
    %c0_84 = arith.constant 0 : index
    %c0_85 = arith.constant 0 : index
    %c77 = arith.constant 77 : index
    %192 = vector.load %arg2[%c0_84, %c0_85, %c77] : memref<1x4x336xf32, #tpu.memory_space<vmem>>, vector<1x4x256xf32>
    %193 = vector.shape_cast %192 : vector<1x4x256xf32> to vector<4x256xf32>
    %c0_i32_86 = arith.constant 0 : i32
    %194 = arith.sitofp %c0_i32_86 : i32 to f32
    %195 = vector.shape_cast %30 : vector<1x256xi1> to vector<1x256xi1>
    %196 = vector.broadcast %195 : vector<1x256xi1> to vector<4x256xi1>
    %197 = vector.broadcast %194 : f32 to vector<4x256xf32>
    %198 = arith.select %196, %193, %197 : vector<4x256xi1>, vector<4x256xf32>
    %199 = tpu.concatenate %191, %198 in 0 : vector<4x256xf32>, vector<4x256xf32> -> vector<8x256xf32>
    %c80 = arith.constant 80 : index
    %c0_87 = arith.constant 0 : index
    %200 = vector.load %arg6[%c80, %c0_87] : memref<100x256xf32, #tpu.memory_space<vmem>>, vector<8x256xf32>
    tpu.vector_store %arg6[%c80, %c0_87], %199 {strides = array<i32>} : memref<100x256xf32, #tpu.memory_space<vmem>>, vector<8x256xf32>,
    %c0_88 = arith.constant 0 : index
    %c0_89 = arith.constant 0 : index
    %c78 = arith.constant 78 : index
    %201 = vector.load %arg2[%c0_88, %c0_89, %c78] : memref<1x4x336xf32, #tpu.memory_space<vmem>>, vector<1x4x256xf32>
    %202 = vector.shape_cast %201 : vector<1x4x256xf32> to vector<4x256xf32>
    %c0_i32_90 = arith.constant 0 : i32
    %203 = arith.sitofp %c0_i32_90 : i32 to f32
    %204 = vector.shape_cast %37 : vector<1x256xi1> to vector<1x256xi1>
    %205 = vector.broadcast %204 : vector<1x256xi1> to vector<4x256xi1>
    %206 = vector.broadcast %203 : f32 to vector<4x256xf32>
    %207 = arith.select %205, %202, %206 : vector<4x256xi1>, vector<4x256xf32>
    %c0_91 = arith.constant 0 : index
    %c0_92 = arith.constant 0 : index
    %c79 = arith.constant 79 : index
    %208 = vector.load %arg2[%c0_91, %c0_92, %c79] : memref<1x4x336xf32, #tpu.memory_space<vmem>>, vector<1x4x256xf32>
    %209 = vector.shape_cast %208 : vector<1x4x256xf32> to vector<4x256xf32>
    %c0_i32_93 = arith.constant 0 : i32
    %210 = arith.sitofp %c0_i32_93 : i32 to f32
    %211 = vector.shape_cast %44 : vector<1x256xi1> to vector<1x256xi1>
    %212 = vector.broadcast %211 : vector<1x256xi1> to vector<4x256xi1>
    %213 = vector.broadcast %210 : f32 to vector<4x256xf32>
    %214 = arith.select %212, %209, %213 : vector<4x256xi1>, vector<4x256xf32>
    %215 = tpu.concatenate %207, %214 in 0 : vector<4x256xf32>, vector<4x256xf32> -> vector<8x256xf32>
    %c88 = arith.constant 88 : index
    %c0_94 = arith.constant 0 : index
    %216 = vector.load %arg6[%c88, %c0_94] : memref<100x256xf32, #tpu.memory_space<vmem>>, vector<8x256xf32>
    tpu.vector_store %arg6[%c88, %c0_94], %215 {strides = array<i32>} : memref<100x256xf32, #tpu.memory_space<vmem>>, vector<8x256xf32>,
    %c0_95 = arith.constant 0 : index
    %c0_96 = arith.constant 0 : index
    %c80_97 = arith.constant 80 : index
    %217 = vector.load %arg2[%c0_95, %c0_96, %c80_97] : memref<1x4x336xf32, #tpu.memory_space<vmem>>, vector<1x4x256xf32>
    %218 = vector.shape_cast %217 : vector<1x4x256xf32> to vector<4x256xf32>
    %c96 = arith.constant 96 : index
    %c0_98 = arith.constant 0 : index
    %219 = vector.load %arg6[%c96, %c0_98] : memref<100x256xf32, #tpu.memory_space<vmem>>, vector<4x256xf32>
    tpu.vector_store %arg6[%c96, %c0_98], %218 {strides = array<i32>} : memref<100x256xf32, #tpu.memory_space<vmem>>, vector<4x256xf32>,
    %c0_99 = arith.constant 0 : index
    %c0_100 = arith.constant 0 : index
    %220 = vector.load %arg3[%c0_99, %c0_100] : memref<8x100xf32, #tpu.memory_space<vmem>>, vector<8x100xf32>
    %c0_101 = arith.constant 0 : index
    %c0_102 = arith.constant 0 : index
    %221 = vector.load %arg6[%c0_101, %c0_102] : memref<100x256xf32, #tpu.memory_space<vmem>>, vector<100x256xf32>
    %cst = arith.constant dense<0.000000e+00> : vector<8x256xf32>
    %222 = tpu.matmul %220, %221, %cst {dimension_numbers = #tpu.dot_dimension_numbers<[1], [0], [0], [1], [0, 0, 1, 1], [], []>} : vector<8x100xf32>, vector<100x256xf32>, vector<8x256xf32> -> vector<8x256xf32>
    %c0_103 = arith.constant 0 : index
    %c0_104 = arith.constant 0 : index
    %223 = vector.load %arg4[%c0_103, %c0_104] : memref<8x1xf32, #tpu.memory_space<vmem>>, vector<8x1xf32>
    %224 = vector.broadcast %223 : vector<8x1xf32> to vector<8x256xf32>
    %225 = arith.addf %222, %224 : vector<8x256xf32>
    %c0_105 = arith.constant 0 : index
    %c0_106 = arith.constant 0 : index
    %c0_107 = arith.constant 0 : index
    %226 = vector.load %arg5[%c0_105, %c0_106, %c0_107] : memref<1x8x256xf32, #tpu.memory_space<vmem>>, vector<1x8x256xf32>
    %227 = vector.shape_cast %226 : vector<1x8x256xf32> to vector<8x256xf32>
    %228 = vector.shape_cast %225 : vector<8x256xf32> to vector<1x8x256xf32>
    tpu.vector_store %arg5[%c0_105, %c0_106, %c0_107], %228 {strides = array<i32>} : memref<1x8x256xf32, #tpu.memory_space<vmem>>, vector<1x8x256xf32>,
    return
  }
  func.func @transform_0(%arg0: i32, %arg1: i32) -> (i32, i32, i32) {
    %c0_i32 = arith.constant 0 : i32
    %c0_i32_0 = arith.constant 0 : i32
    %c0_i32_1 = arith.constant 0 : i32
    return %arg0, %c0_i32, %c0_i32_0 : i32, i32, i32
  }
  func.func @transform_1(%arg0: i32, %arg1: i32) -> (i32, i32) {
    %c0_i32 = arith.constant 0 : i32
    %c0_i32_0 = arith.constant 0 : i32
    %c0_i32_1 = arith.constant 0 : i32
    return %c0_i32, %c0_i32_0 : i32, i32
  }
  func.func @transform_2(%arg0: i32, %arg1: i32) -> (i32, i32) {
    %c0_i32 = arith.constant 0 : i32
    %c0_i32_0 = arith.constant 0 : i32
    %c0_i32_1 = arith.constant 0 : i32
    return %c0_i32, %c0_i32_0 : i32, i32
  }
  func.func @transform_3(%arg0: i32, %arg1: i32) -> (i32, i32, i32) {
    %c0_i32 = arith.constant 0 : i32
    %c0_i32_0 = arith.constant 0 : i32
    return %arg0, %c0_i32, %arg1 : i32, i32, i32
  }
}

</mosaic_0001>

<bundles_post_ra>
// kernel: tpu_custom_call.1
= control target key start
LH: loop header
LB: loop body
LE: loop exit
PB: predicated region body
PF: predicated region fallthrough
CT: control target
= control target key end

     0   :  { %8 = vsyncpa [#allocation4], 0  ;;  %s1801_s0 = inlined_call_operand.hbm [shape: f32[2,4,336], index: 0, kind: input, shape index: {}]   ;;  %s1802_s1 = inlined_call_operand.vmem [shape: f32[8,100], index: 1, kind: input, shape index: {}]   ;;  %s1803_s2 = inlined_call_operand.vmem [shape: f32[8,1], index: 2, kind: input, shape index: {}]   ;;  %s1804_s3 = inlined_call_operand.hbm [shape: f32[2,8,256], index: 3, kind: output, shape index: {}]  }
   0x1   :  { %10 = vsyncpa [#allocation4 + $0x1], 0 }
   0x2   :  { %11 = vsyncpa [#allocation5], 0 }
   0x3   :  { %13 = vsyncpa [#allocation5 + $0x1], 0  ;;  %s1311_s12 = smov 0   ;;  %s1313_s13 = smov 0  }
   0x4   :  { %s1315_s14 = smov 0   ;;  %s1317_s15 = smov 0  }
   0x5   :  { %s1319_s16 = smov 0   ;;  %s1321_s17 = smov 0  }
   0x6 LB: > { %s1008_s18 = sadd.s32 4294967295, %s1259_s17   ;;  %s1009_s19 = sadd.s32 4294967294, %s1259_s17   ;;  %s1259_s17 = sphi %s1321_s17, %s19_s17   ;;  %s1255_s16 = sphi %s1319_s16, %s1819_s16   ;;  %s1251_s15 = sphi %s1317_s15, %s1818_s15   ;;  %s1247_s14 = sphi %s1315_s14, %s1817_s14   ;;  %s1243_s13 = sphi %s1313_s13, %s1816_s13   ;;  %s1239_s12 = sphi %s1311_s12, %s1815_s12  }
   0x7   : > { %s31_s20 = sadd.s32 1, %s1255_s16  ;;  %s38_s21 = sadd.s32 1, %s1247_s14 }
   0x8   : > { %p33_p0 = scmp.ge.s32.totalorder %s31_s20, 2  ;;  %p45_p1 = scmp.ne.s32.totalorder %s1247_s14, %s1243_s13 }
   0x9   : > { %p46_p2 = scmp.eq.s32.totalorder %s1259_s17, 0  ;;  %p51_p3 = scmp.ne.s32.totalorder %s1243_s13, %s1239_s12 }
   0xa   : > { %s1821_s20 = smov (%p33_p0, %s31_s20), 0  ;;  %p52_p5 = scmp.eq.s32.totalorder %s1008_s18, 0 }
   0xb   : > { %p1352_p4 = por %p46_p2, %p45_p1  ;;  %s35_s23 = ssub.s32 %s1255_s16, %s1821_s20 }
   0xc   : > { %p119_p6 = scmp.eq.s32.totalorder %s1008_s18, 1  ;;  %p36_p7 = scmp.eq.s32.totalorder %s35_s23, 0 }
   0xd   : > { %p1358_p8 = por %p52_p5, %p51_p3  ;;  %p125_p10 = scmp.eq.s32.totalorder %s1009_s19, 1 }
   0xe   : > { %p1362_p9 = por %p119_p6, %p45_p1  ;;  %p1063_p13 = scmp.lt.s32.totalorder %s1259_s17, 2 }
   0xf   : > { %s1367_s26 = scalar_select %p36_p7, %s1247_s14, %s38_s21  }
  0x10   : > { %s1808_s25 = scalar_select %p1362_p9, 1, 0 }
  0x11   : > { %p1369_p11 = por %p125_p10, %p51_p3  ;;  %s151_s28 = sand.u32 1, %s1247_s14  }
  0x12   : > { %s1048_s29 = smul.u32 12, %s151_s28  ;;  %p1379_p0 = pnand %p1063_p13, %p1352_p4 }
  0x13   : > { %s1809_s27 = scalar_select %p1369_p11, 1, 0 }
  0x14   : > { %s1049_s30 = smul.u32 192, %s1255_s16  ;;  %s155_s8 = scalar_lea.vmem [#allocation3], %s1048_s29 }
  0x15   : > { %s163_s9 = sshll.u32 %s155_s8, 4  ;;  %s152_s10 = scalar_lea.sflag [#allocation4], %s151_s28  ;;  %s1389_s9 = int_to_ptr.vmem [resolvable:$true] %s163_s9 }
  0x16   : > { %s1387_s7 = scalar_lea.hbm %s1801_s0, %s1049_s30  ;;  %p1149_p3 = pneg %p1379_p0 }
  0x17   : > { %s1147_s11 = scalar_lea.hbm %s1387_s7, 192  ;;  %s1152_s21 = scalar_lea.hbm %s1801_s0, 384 }
  0x18   : > { %p1148_p2 = scmp.ne.s32.totalorder %s1387_s7, %s1147_s11  ;;  %p1153_p6 = scmp.lt.u32.totalorder %s1387_s7, %s1801_s0 }
  0x19   : > { %p1154_p7 = scmp.lt.u32.totalorder %s1152_s21, %s1147_s11  ;;  %p1156_p13 = scmp.lt.u32.totalorder %s1147_s11, %s1387_s7 }
  0x1a   : > { %p1150_p4 = pnand %p1149_p3, %p1148_p2 }
  0x1b   : > { %p1155_p10 = por %p1154_p7, %p1153_p6 }
  0x1c   : > { %p1151_p5 = pneg %p1150_p4 }
  0x1d   : > { %p1157_p12 = por %p1156_p13, %p1155_p10 }
  0x1f   : > { %p1158_p1 = pnand %p1157_p12, %p1151_p5 }
  0x21   : > { %1161 = shalt.err (!%p1158_p1)
}
  0x22   : > { %s1162_s28 = scalar_lea.vmem %s1389_s9, 192  ;;  %s1261_s29 = smov [#allocation3]  }
  0x23   : > { %p1163_p2 = scmp.ne.s32.totalorder %s1389_s9, %s1162_s28  ;;  %s1167_s30 = sshll.u32 %s1261_s29, 4  ;;  %s1168_s30 = int_to_ptr.vmem [resolvable:$false] %s1167_s30 }
  0x24   : > { %s1169_s5 = scalar_lea.vmem %s1168_s30, 384  ;;  %p1170_p9 = scmp.lt.s32.totalorder %s1389_s9, %s1168_s30 }
  0x25   : > { %p1165_p4 = pnand %p1163_p2, %p1149_p3  ;;  %p1171_p6 = scmp.lt.s32.totalorder %s1169_s5, %s1162_s28 }
  0x27   : > { %p1166_p11 = pneg %p1165_p4  ;;  %p1172_p7 = por %p1171_p6, %p1170_p9 }
  0x29   : > { %p1173_p10 = pnand %p1172_p7, %p1166_p11 }
  0x2b   : > { %1176 = shalt.err (!%p1173_p10)
}
  0x2c   : > { %1058 = dma.hbm_to_vmem [thread:$0]  (!%p1379_p0), %s1387_s7, 192, %s1389_s9, %s152_s10  }
  0x2d   : > { %p168_p12 = scmp.lt.s32.totalorder %s1259_s17, 3  ;;  %p1811_p1 = scmp.ge.s32.totalorder %s1259_s17, 1 }
  0x2f   : > { %p169_p3 = pnand %p1811_p1, %p168_p12 }
  0x30   : > { %s1420_s6 = sand.u32 (!%p169_p3), 1, %s1243_s13  }
  0x31   : > { %172 = sbr.rel (%p169_p3) target bundleno = 687 (0x2af), region = 32  ;;  %s175_s11 = scalar_lea.sflag (!%p169_p3), [#allocation4], %s1420_s6 }
  0x32   : > { %s1050_s8 = smul.u32 (!%p169_p3), 12, %s1420_s6 }
  0x34   : > { %s1424_s18 = scalar_lea.vmem (!%p169_p3), [#allocation3], %s1050_s8 }
  0x38   : > { %1230 = dma.done.wait (%p1358_p8), %s175_s11, 192  }
  0x39   : > { %1232 = vsyncadd (%p1358_p8), %s175_s11, 4294967104  ;;  %v1431_v0 = vld [vmem:[%s1424_s18] sm:$0xff]  ;;  %v1434_v1 = vld [vmem:[%s1424_s18 + $0x8] sm:$0xf]  ;;  %s1262_s4 = smov 100   ;;  %s1263_s24 = smov 68   ;;  %v202_v11 = vlaneseq }
  0x3a   : > { %365 = vrot.lane.b32.xlu0 %v1431_v0, %s1262_s4  ;;  %369 = vrot.lane.b32.xlu1 %v1434_v1, %s1262_s4  ;;  %v1440_v2 = vcombine.high %v1431_v0, %v1431_v0  ;;  %v1445_v3 = vld [vmem:[%s1424_s18 + $0x8] sm:$0xf]  ;;  %s1264_s7 = smov 115   ;;  %s1265_s9 = smov 113   ;;  %v1474_v10 = vcombine.low %v1431_v0, %v1431_v0  ;;  %vm371_vm0 = vcmask 818176   ;;  %vm580_vm3 = vcmask 556032  }
  0x3b   : > { %v262_v4 = vld [vmem:[%s1424_s18 + $0x8] sm:$0xf]  ;;  %s1266_s10 = smov 116   ;;  %s1267_s19 = smov 114   ;;  %v203_v12 = vand.u32 127, %v202_v11  ;;  %vm293_vm4 = vcmask 941056  }
  0x3c   : > { %v312_v5 = vld [vmem:[%s1424_s18 + $0x8] sm:$0xf]  ;;  %s1268_s21 = smov 98   ;;  %s1269_s22 = smov 99   ;;  %vm343_vm6 = vcmask 924672   ;;  %vm276_vm8 = vcmask 949248  }
  0x3d   : > { %v412_v6 = vld [vmem:[%s1424_s18 + $0x8] sm:$0xf]  ;;  %s1270_s23 = smov 83   ;;  %s1271_s28 = smov 97   ;;  %v204_v13 = vadd.s32 128, %v203_v12  ;;  %v1478_v14 = vand.u32 15, %v203_v12 }
  0x3e   : > { %367 = vrot.lane.b32.xlu0 %v1440_v2, %s1262_s4  ;;  %574 = vrot.lane.b32.xlu1 %v1431_v0, %s1263_s24  ;;  %v488_v7 = vld [vmem:[%s1424_s18 + $0x8] sm:$0xf]  ;;  %s1272_s29 = smov 84   ;;  %s1273_s30 = smov 96   ;;  %vm306_vm10 = vcmask 1043456   ;;  %vm326_vm12 = vcmask 932864  }
  0x3f   : > { %v453_v8 = vld [vmem:[%s1424_s18 + $0x8] sm:$0xf]  ;;  %v216_v15 = vand.u32 15, %v204_v13  ;;  %v1481_v16 = vadd.s32 4294967292, %v1478_v14  ;;  %s1274_s5 = smov 16   ;;  %s1275_s8 = smov 81  }
  0x40   : > { %v471_v9 = vcombine.low %v453_v8, %v453_v8  ;;  %v529_v33 = vld [vmem:[%s1424_s18 + $0x8] sm:$0xf]  ;;  %s1276_s11 = smov 48   ;;  %v1510_v45 = vadd.s32 4294967295, %v1478_v14  ;;  %s1277_s4 = smov 82   ;;  %v1517_v49 = vadd.s32 4294967293, %v1478_v14 }
  0x41   : > { %v1483_v17 = vadd.s32 4294967292, %v216_v15  ;;  %vm231_vm1 = vcmp.ge.s32.totalorder %v1481_v16, 0  ;;  %v1499_v38 = vadd.s32 4294967293, %v216_v15  ;;  %v1505_v43 = vadd.s32 4294967295, %v216_v15  ;;  %v621_v59 = vld [vmem:[%s1424_s18 + $0x8] sm:$0xf] }
  0x42   : > { %576 = vrot.lane.b32.xlu0 %v1440_v2, %s1263_s24  ;;  %578 = vrot.lane.b32.xlu1 %v1445_v3, %s1263_s24  ;;  %v1519_v51 = vadd.s32 4294967294, %v216_v15  ;;  %vm255_vm9 = vcmp.ge.s32.totalorder %v1510_v45, 0  ;;  %vm239_vm11 = vcmp.ge.s32.totalorder %v1517_v49, 0  ;;  %v1535_v62 = vadd.s32 4294967294, %v1478_v14  ;;  %s1278_s24 = smov 66   ;;  %p1812_p9 = scmp.ne.s32.totalorder %s1808_s25, 0 }
  0x43   : > { %vm232_vm2 = vcmp.ge.s32.totalorder %v1483_v17, 0  ;;  %vm240_vm5 = vcmp.ge.s32.totalorder %v1499_v38, 0  ;;  %vm256_vm7 = vcmp.ge.s32.totalorder %v1505_v43, 0  ;;  %vm435_vm15 = vcmask 801792  }
  0x44   : > { %vm248_vm13 = vcmp.ge.s32.totalorder %v1519_v51, 0  ;;  %vm247_vm14 = vcmp.ge.s32.totalorder %v1535_v62, 0 }
  0x46   : > { %291 = vrot.lane.b32.xlu1 %v262_v4, %s1264_s7  ;;  %289 = vrot.lane.b32.xlu0 %v1440_v2, %s1264_s7 }
  0x4a   : > { %341 = vrot.lane.b32.xlu1 %v312_v5, %s1265_s9  ;;  %339 = vrot.lane.b32.xlu0 %v1440_v2, %s1265_s9 }
  0x4e   : > { %337 = vrot.lane.b32.xlu1 %v1431_v0, %s1265_s9  ;;  %287 = vrot.lane.b32.xlu0 %v1431_v0, %s1264_s7  ;;  %s1279_s7 = smov 67   ;;  %s1280_s9 = smov 65  }
  0x52   : > { %274 = vrot.lane.b32.xlu1 %v262_v4, %s1266_s10  ;;  %272 = vrot.lane.b32.xlu0 %v1440_v2, %s1266_s10 }
  0x56   : > { %324 = vrot.lane.b32.xlu1 %v312_v5, %s1267_s19  ;;  %322 = vrot.lane.b32.xlu0 %v1440_v2, %s1267_s19 }
  0x5a   : > { %320 = vrot.lane.b32.xlu1 %v1431_v0, %s1267_s19  ;;  %270 = vrot.lane.b32.xlu0 %v1431_v0, %s1266_s10  ;;  %s1281_s10 = smov 64   ;;  %s1282_s19 = smov 51  }
  0x5e   : > { %433 = vrot.lane.b32.xlu1 %v412_v6, %s1268_s21  ;;  %431 = vrot.lane.b32.xlu0 %v1440_v2, %s1268_s21 }
  0x62   : > { %418 = vrot.lane.b32.xlu1 %v1440_v2, %s1269_s22  ;;  %429 = vrot.lane.b32.xlu0 %v1431_v0, %s1268_s21  ;;  %s1283_s21 = smov 49  }
  0x66   : > { %416 = vrot.lane.b32.xlu1 %v1431_v0, %s1269_s22  ;;  %420 = vrot.lane.b32.xlu0 %v412_v6, %s1269_s22  ;;  %s1284_s22 = smov 112  }
  0x6a   : > { %509 = vrot.lane.b32.xlu1 %v488_v7, %s1270_s23  ;;  %507 = vrot.lane.b32.xlu0 %v1440_v2, %s1270_s23 }
  0x6e   : > { %505 = vrot.lane.b32.xlu1 %v1431_v0, %s1270_s23  ;;  %459 = vrot.lane.b32.xlu0 %v1440_v2, %s1271_s28  ;;  %s1285_s23 = smov 80  }
  0x72   : > { %461 = vrot.lane.b32.xlu1 %v453_v8, %s1271_s28  ;;  %494 = vrot.lane.b32.xlu0 %v1440_v2, %s1272_s29 }
  0x76   : > { %496 = vrot.lane.b32.xlu1 %v488_v7, %s1272_s29  ;;  %457 = vrot.lane.b32.xlu0 %v1431_v0, %s1271_s28  ;;  %s1286_s28 = smov 52  }
  0x7a   : > { %474 = vrot.lane.b32.xlu1 %v1431_v0, %s1273_s30  ;;  %476 = vrot.lane.b32.xlu0 %v471_v9, %s1273_s30 }
  0x7e   : > { %492 = vrot.lane.b32.xlu1 %v1431_v0, %s1272_s29  ;;  %472 = vrot.lane.b32.xlu0 %v1474_v10, %s1273_s30  ;;  %s1287_s29 = smov 50  }
  0xac   : > { %v366_v18 = vpop.permute.xlu0 %365  ;;  %v370_v19 = vpop.permute.xlu1 %369 }
  0xb0   : > { %v368_v20 = vpop.permute.xlu0 %367  ;;  %v575_v21 = vpop.permute.xlu1 %574 }
  0xb1   : > { %v372_v22 = vsel %vm371_vm0, %v366_v18, %v368_v20  ;;  %v373_v23 = vsel %vm371_vm0, %v368_v20, %v370_v19 }
  0xb2   : > { %v376_v24 = vsel %vm231_vm1, %v372_v22, 0.0  ;;  %v377_v25 = vsel %vm232_vm2, %v373_v23, 0.0 }
  0xb3   : > { %v381_v26 = vrot.slane %v376_v24, 4  ;;  %v382_v27 = vrot.slane %v377_v25, 4 }
  0xb4   : > { %v577_v28 = vpop.permute.xlu0 %576  ;;  %v579_v29 = vpop.permute.xlu1 %578 }
  0xb5   : > { %v581_v30 = vsel %vm580_vm3, %v575_v21, %v577_v28  ;;  %385 = vrot.lane.b32.xlu1 %v382_v27, %s1274_s5  ;;  %383 = vrot.lane.b32.xlu0 %v381_v26, %s1274_s5  ;;  %v582_v31 = vsel %vm580_vm3, %v577_v28, %v579_v29  ;;  %v662_v28 = vld [vmem:[%s1424_s18 + $0x8] sm:$0xf]  ;;  %vm422_vm3 = vcmask 809984  }
  0xb6   : > { %v586_v32 = vsel %vm232_vm2, %v582_v31, 0.0  ;;  %v585_v34 = vsel %vm231_vm1, %v581_v30, 0.0 }
  0xb7   : > { %v591_v37 = vrot.slane %v586_v32, 4  ;;  %v590_v39 = vrot.slane %v585_v34, 4 }
  0xb8   : > { %v292_v35 = vpop.permute.xlu1 %291  ;;  %v290_v36 = vpop.permute.xlu0 %289 }
  0xb9   : > { %548 = vrot.lane.b32.xlu1 %v1440_v2, %s1275_s8  ;;  %550 = vrot.lane.b32.xlu0 %v529_v33, %s1275_s8  ;;  %v295_v42 = vsel %vm293_vm4, %v290_v36, %v292_v35 }
  0xba   : > { %v299_v44 = vsel %vm240_vm5, %v295_v42, 0.0 }
  0xbb   : > { %v303_v50 = vrot.slane %v299_v44, 4 }
  0xbc   : > { %v342_v40 = vpop.permute.xlu1 %341  ;;  %v340_v41 = vpop.permute.xlu0 %339 }
  0xbd   : > { %594 = vrot.lane.b32.xlu1 %v591_v37, %s1276_s11  ;;  %592 = vrot.lane.b32.xlu0 %v590_v39, %s1276_s11  ;;  %v345_v48 = vsel %vm343_vm6, %v340_v41, %v342_v40 }
  0xbe   : > { %v349_v52 = vsel %vm256_vm7, %v345_v48, 0.0 }
  0xbf   : > { %v353_v60 = vrot.slane %v349_v52, 4  ;;  %v1580_v52 = vld [vmem:[%s1424_s18 + $0x8] sm:$0xf] }
  0xc0   : > { %v338_v46 = vpop.permute.xlu1 %337  ;;  %v288_v47 = vpop.permute.xlu0 %287 }
  0xc1   : > { %546 = vrot.lane.b32.xlu1 %v1431_v0, %s1275_s8  ;;  %535 = vrot.lane.b32.xlu0 %v1440_v2, %s1277_s4  ;;  %v344_v55 = vsel %vm343_vm6, %v338_v46, %v340_v41  ;;  %v294_v56 = vsel %vm293_vm4, %v288_v47, %v290_v36  ;;  %v680_v41 = vcombine.low %v662_v28, %v662_v28  ;;  %vm511_vm4 = vcmask 678912  }
  0xc2   : > { %v348_v63 = vsel %vm255_vm9, %v344_v55, 0.0  ;;  %v298_v4 = vsel %vm239_vm11, %v294_v56, 0.0  ;;  %v1588_v56 = vld [vmem:[%s1424_s18 + $0x8] sm:$0xf]  ;;  %vm463_vm6 = vcmask 793600  }
  0xc3   : > { %v352_v9 = vrot.slane %v348_v63, 4  ;;  %v302_v11 = vrot.slane %v298_v4, 4 }
  0xc4   : > { %v275_v53 = vpop.permute.xlu1 %274  ;;  %v273_v54 = vpop.permute.xlu0 %272 }
  0xc5   : > { %537 = vrot.lane.b32.xlu1 %v529_v33, %s1277_s4  ;;  %533 = vrot.lane.b32.xlu0 %v1431_v0, %s1277_s4  ;;  %v278_v57 = vsel %vm276_vm8, %v273_v54, %v275_v53  ;;  %s1023_s4 = sshll.u32 %s1251_s15, 8 }
  0xc6   : > { %v282_v58 = vsel %vm232_vm2, %v278_v57, 0.0 }
  0xc7   : > { %v308_v61 = vsel %vm306_vm10, %v282_v58, %v303_v50 }
  0xc8   : > { %v325_v5 = vpop.permute.xlu1 %324  ;;  %v323_v6 = vpop.permute.xlu0 %322 }
  0xc9   : > { %v328_v7 = vsel %vm326_vm12, %v323_v6, %v325_v5  ;;  %640 = vrot.lane.b32.xlu1 %v1440_v2, %s1278_s24  ;;  %642 = vrot.lane.b32.xlu0 %v621_v59, %s1278_s24 }
  0xca   : > { %v332_v8 = vsel %vm248_vm13, %v328_v7, 0.0 }
  0xcb   : > { %v357_v12 = vsel %vm306_vm10, %v332_v8, %v353_v60 }
  0xcc   : > { %v321_v13 = vpop.permute.xlu1 %320  ;;  %v271_v14 = vpop.permute.xlu0 %270  ;;  %v1024_v15 = vpack.c.bf16 %v357_v12, %v308_v61 }
  0xcd   : > { %v327_v18 = vsel %vm326_vm12, %v321_v13, %v323_v6  ;;  %v277_v19 = vsel %vm276_vm8, %v271_v14, %v273_v54  ;;  %627 = vrot.lane.b32.xlu1 %v1440_v2, %s1279_s7  ;;  %638 = vrot.lane.b32.xlu0 %v1431_v0, %s1278_s24  ;;  %vm498_vm8 = vcmask 687104   ;;  %vm478_vm12 = vcmask 785408  }
  0xce   : > { %v331_v20 = vsel %vm247_vm14, %v327_v18, 0.0  ;;  %v281_v21 = vsel %vm231_vm1, %v277_v19, 0.0  ;;  %1025 = vmatprep.subr.bf16.mxu0 %v1024_v15 }
  0xcf   : > { %v356_v22 = vsel %vm306_vm10, %v331_v20, %v352_v9  ;;  %v307_v23 = vsel %vm306_vm10, %v281_v21, %v302_v11 }
  0xd0   : > { %v434_v24 = vpop.permute.xlu1 %433  ;;  %v432_v25 = vpop.permute.xlu0 %431  ;;  %v1026_v26 = vpack.c.bf16 %v356_v22, %v307_v23 }
  0xd1   : > { %v437_v27 = vsel %vm435_vm15, %v432_v25, %v434_v24  ;;  %668 = vrot.lane.b32.xlu1 %v1440_v2, %s1280_s9  ;;  %629 = vrot.lane.b32.xlu0 %v621_v59, %s1279_s7 }
  0xd2   : > { %1027 = vmatpush1.bf16.msra.mxu0 %v1026_v26  ;;  %v441_v29 = vsel %vm248_vm13, %v437_v27, 0.0 }
  0xd3   : > { %v445_v34 = vrot.slane %v441_v29, 4 }
  0xd4   : > { %v419_v30 = vpop.permute.xlu1 %418  ;;  %v430_v31 = vpop.permute.xlu0 %429 }
  0xd5   : > { %v436_v32 = vsel %vm435_vm15, %v430_v31, %v432_v25  ;;  %625 = vrot.lane.b32.xlu1 %v1431_v0, %s1279_s7  ;;  %670 = vrot.lane.b32.xlu0 %v662_v28, %s1280_s9  ;;  %vm387_vm15 = vcmask 130048  }
  0xd6   : > { %v440_v33 = vsel %vm247_vm14, %v436_v32, 0.0 }
  0xd7   : > { %v444_v35 = vrot.slane %v440_v33, 4 }
  0xd8   : > { %v417_v36 = vpop.permute.xlu1 %416  ;;  %v421_v37 = vpop.permute.xlu0 %420 }
  0xd9   : > { %v423_v39 = vsel %vm422_vm3, %v417_v36, %v419_v30  ;;  %v424_v40 = vsel %vm422_vm3, %v419_v30, %v421_v37  ;;  %683 = vrot.lane.b32.xlu1 %v1431_v0, %s1281_s10  ;;  %666 = vrot.lane.b32.xlu0 %v1431_v0, %s1280_s9  ;;  %vm552_vm3 = vcmask 662528  }
  0xda   : > { %v427_v42 = vsel %vm239_vm11, %v423_v39, 0.0  ;;  %v428_v44 = vsel %vm240_vm5, %v424_v40, 0.0 }
  0xdb   : > { %v1573_v46 = vsel %vm306_vm10, %v427_v42, %v444_v35  ;;  %v1576_v47 = vsel %vm306_vm10, %v428_v44, %v445_v34 }
  0xdc   : > { %v510_v48 = vpop.permute.xlu1 %509  ;;  %v508_v50 = vpop.permute.xlu0 %507 }
  0xdd   : > { %681 = vrot.lane.b32.xlu1 %v1474_v10, %s1281_s10  ;;  %685 = vrot.lane.b32.xlu0 %v680_v41, %s1281_s10  ;;  %v513_v55 = vsel %vm511_vm4, %v508_v50, %v510_v48 }
  0xde   : > { %v517_v10 = vsel %vm240_vm5, %v513_v55, 0.0 }
  0xdf   : > { %v521_v59 = vrot.slane %v517_v10, 4 }
  0xe0   : > { %v506_v53 = vpop.permute.xlu1 %505  ;;  %v460_v54 = vpop.permute.xlu0 %459 }
  0xe1   : > { %718 = vrot.lane.b32.xlu1 %v1580_v52, %s1282_s19  ;;  %716 = vrot.lane.b32.xlu0 %v1440_v2, %s1282_s19  ;;  %v512_v4 = vsel %vm511_vm4, %v506_v53, %v508_v50  ;;  %vm539_vm4 = vcmask 670720  }
  0xe2   : > { %v516_v9 = vsel %vm239_vm11, %v512_v4, 0.0 }
  0xe3   : > { %v520_v18 = vrot.slane %v516_v9, 4 }
  0xe4   : > { %v462_v57 = vpop.permute.xlu1 %461  ;;  %v495_v58 = vpop.permute.xlu0 %494 }
  0xe5   : > { %759 = vrot.lane.b32.xlu1 %v1588_v56, %s1283_s21  ;;  %757 = vrot.lane.b32.xlu0 %v1440_v2, %s1283_s21  ;;  %v465_v60 = vsel %vm463_vm6, %v460_v54, %v462_v57 }
  0xe6   : > { %v469_v7 = vsel %vm256_vm7, %v465_v60, 0.0 }
  0xe8   : > { %v497_v61 = vpop.permute.xlu1 %496  ;;  %v458_v63 = vpop.permute.xlu0 %457 }
  0xe9   : > { %v500_v5 = vsel %vm498_vm8, %v495_v58, %v497_v61  ;;  %v464_v11 = vsel %vm463_vm6, %v458_v63, %v460_v54  ;;  %vm596_vm6 = vcmask 392192  }
  0xea   : > { %v504_v6 = vsel %vm232_vm2, %v500_v5, 0.0  ;;  %v468_v19 = vsel %vm255_vm9, %v464_v11, 0.0 }
  0xeb   : > { %v1604_v8 = vsel %vm306_vm10, %v504_v6, %v521_v59 }
  0xec   : > { %v475_v12 = vpop.permute.xlu1 %474  ;;  %v477_v13 = vpop.permute.xlu0 %476 }
  0xed   : > { %v480_v14 = vsel %vm478_vm12, %v475_v12, %v477_v13 }
  0xee   : > { %v1610_v15 = vsel %vm306_vm10, %v469_v7, %v480_v14 }
  0xef   : > { %v1032_v20 = vpack.c.bf16 %v1604_v8, %v1610_v15 }
  0xf0   : > { %v493_v21 = vpop.permute.xlu1 %492  ;;  %v473_v22 = vpop.permute.xlu0 %472 }
  0xf1   : > { %v499_v23 = vsel %vm498_vm8, %v493_v21, %v495_v58  ;;  %v479_v24 = vsel %vm478_vm12, %v473_v22, %v475_v12  ;;  %vm644_vm8 = vcmask 539648   ;;  %vm631_vm12 = vcmask 547840  }
  0xf2   : > { %v503_v25 = vsel %vm231_vm1, %v499_v23, 0.0  ;;  %v1620_v26 = vsel %vm306_vm10, %v468_v19, %v479_v24  ;;  %v779_v24 = vld [vmem:[%s1424_s18 + $0x8] sm:$0xf] }
  0xf3   : > { %v1623_v27 = vsel %vm306_vm10, %v503_v25, %v520_v18 }
  0xf4   : > { %v1034_v28 = vpack.c.bf16 %v1623_v27, %v1620_v26 }
 0x127   : > { %v386_v29 = vpop.permute.xlu1 %385  ;;  %v384_v30 = vpop.permute.xlu0 %383 }
 0x128   : > { %v394_v31 = vsel %vm306_vm10, %v1434_v1, %v386_v29  ;;  %v392_v32 = vsel %vm306_vm10, %v1431_v0, %v384_v30  ;;  %v388_v40 = vsel %vm387_vm15, %v384_v30, %v386_v29  ;;  %vm672_vm15 = vcmask 531456  }
 0x129   : > { %402 = vrot.lane.b32.xlu1 %v394_v31, %s1284_s22  ;;  %398 = vrot.lane.b32.xlu0 %v392_v32, %s1284_s22  ;;  %v393_v48 = vsel %vm306_vm10, %v1440_v2, %v388_v40  ;;  %v1289_v40 = vmov 0  }
 0x12a   : > { %1141 = vset.pattern.permute.xlu1 %v1289_v40  ;;  %1142 = vset.pattern.permute.xlu0 %v1289_v40 }
 0x12b   : > { %v549_v33 = vpop.permute.xlu1 %548  ;;  %v551_v34 = vpop.permute.xlu0 %550 }
 0x12c   : > { %v554_v1 = vsel %vm552_vm3, %v549_v33, %v551_v34  ;;  %v1288_v34 = vmov 0.0  }
 0x12d   : > { %v558_v50 = vsel %vm256_vm7, %v554_v1, 0.0  ;;  %901 = vmatprep.mubr.f32.mxu0 %v1288_v34 }
 0x12e   : > { %v562_v55 = vrot.slane %v558_v50, 4 }
 0x12f   : > { %v595_v35 = vpop.permute.xlu1 %594  ;;  %v593_v36 = vpop.permute.xlu0 %592 }
 0x130   : > { %v603_v37 = vsel %vm306_vm10, %v1445_v3, %v595_v35  ;;  %v601_v39 = vsel %vm306_vm10, %v1431_v0, %v593_v36  ;;  %v597_v59 = vsel %vm596_vm6, %v593_v36, %v595_v35  ;;  %v822_v35 = vld [vmem:[%s1803_s2] sm:$0xff] }
 0x131   : > { %611 = vrot.lane.b32.xlu0 %v603_v37, %s1285_s23  ;;  %607 = vrot.lane.b32.xlu1 %v601_v39, %s1285_s23  ;;  %v602_v7 = vsel %vm306_vm10, %v1440_v2, %v597_v59 }
 0x133   : > { %v547_v41 = vpop.permute.xlu1 %546  ;;  %v536_v42 = vpop.permute.xlu0 %535 }
 0x134   : > { %v553_v44 = vsel %vm552_vm3, %v547_v41, %v549_v33  ;;  %vm687_vm3 = vcmask 523264  }
 0x135   : > { %v557_v3 = vsel %vm255_vm9, %v553_v44, 0.0  ;;  %400 = vrot.lane.b32.xlu0 %v393_v48, %s1284_s22  ;;  %755 = vrot.lane.b32.xlu1 %v1431_v0, %s1283_s21  ;;  %s911_s21 = scalar_lea.sflag [#allocation5], %s1420_s6  ;;  %s1290_s22 = smov [#allocation6]  }
 0x136   : > { %v561_v10 = vrot.slane %v557_v3, 4 }
 0x137   : > { %v538_v53 = vpop.permute.xlu1 %537  ;;  %v534_v54 = vpop.permute.xlu0 %533 }
 0x138   : > { %v541_v57 = vsel %vm539_vm4, %v536_v42, %v538_v53  ;;  %v540_v58 = vsel %vm539_vm4, %v534_v54, %v536_v42  ;;  %vm404_vm4 = vcmask 916480  }
 0x139   : > { %v545_v60 = vsel %vm248_vm13, %v541_v57, 0.0  ;;  %v544_v61 = vsel %vm247_vm14, %v540_v58, 0.0  ;;  %714 = vrot.lane.b32.xlu0 %v1431_v0, %s1282_s19  ;;  %705 = vrot.lane.b32.xlu1 %v1580_v52, %s1286_s28  ;;  %s1752_s19 = scalar_lea.hbm %s1804_s3, %s1023_s4 }
 0x13a   : > { %v1654_v63 = vsel %vm306_vm10, %v545_v60, %v562_v55  ;;  %v1657_v4 = vsel %vm306_vm10, %v544_v61, %v561_v10 }
 0x13b   : > { %v641_v5 = vpop.permute.xlu1 %640  ;;  %v643_v6 = vpop.permute.xlu0 %642 }
 0x13c   : > { %v646_v9 = vsel %vm644_vm8, %v641_v5, %v643_v6 }
 0x13d   : > { %703 = vrot.lane.b32.xlu0 %v1440_v2, %s1286_s28  ;;  %609 = vrot.lane.b32.xlu1 %v602_v7, %s1285_s23  ;;  %v650_v52 = vsel %vm248_vm13, %v646_v9, 0.0  ;;  %s1181_s23 = sshll.u32 %s1290_s22, 4  ;;  %s1182_s23 = int_to_ptr.vmem [resolvable:$false] %s1181_s23 }
 0x13e   : > { %v654_v14 = vrot.slane %v650_v52, 4 }
 0x13f   : > { %v628_v11 = vpop.permute.xlu1 %627  ;;  %v639_v12 = vpop.permute.xlu0 %638 }
 0x140   : > { %v645_v13 = vsel %vm644_vm8, %v639_v12, %v641_v5  ;;  %vm720_vm8 = vcmask 416768  }
 0x141   : > { %744 = vrot.lane.b32.xlu0 %v1440_v2, %s1287_s29  ;;  %746 = vrot.lane.b32.xlu1 %v1588_v56, %s1287_s29  ;;  %v649_v18 = vsel %vm247_vm14, %v645_v13, 0.0 }
 0x142   : > { %v653_v25 = vrot.slane %v649_v18, 4 }
 0x143   : > { %v669_v19 = vpop.permute.xlu1 %668  ;;  %v630_v21 = vpop.permute.xlu0 %629 }
 0x144   : > { %v633_v22 = vsel %vm631_vm12, %v628_v11, %v630_v21 }
 0x145   : > { %701 = vrot.lane.b32.xlu0 %v1431_v0, %s1286_s28  ;;  %742 = vrot.lane.b32.xlu1 %v1431_v0, %s1287_s29  ;;  %v637_v23 = vsel %vm240_vm5, %v633_v22, 0.0  ;;  %s1183_s28 = scalar_lea.vmem %s1182_s23, 512 }
 0x146   : > { %v1675_v29 = vsel %vm306_vm10, %v637_v23, %v654_v14 }
 0x147   : > { %v626_v56 = vpop.permute.xlu1 %625  ;;  %v671_v30 = vpop.permute.xlu0 %670 }
 0x148   : > { %v632_v31 = vsel %vm631_vm12, %v626_v56, %v628_v11  ;;  %v674_v36 = vsel %vm672_vm15, %v669_v19, %v671_v30  ;;  %vm761_vm12 = vcmask 400384  }
 0x149   : > { %785 = vrot.lane.b32.xlu0 %v1440_v2, %s1276_s11  ;;  %787 = vrot.lane.b32.xlu1 %v779_v24, %s1276_s11  ;;  %v636_v32 = vsel %vm239_vm11, %v632_v31, 0.0  ;;  %v678_v1 = vsel %vm256_vm7, %v674_v36, 0.0 }
 0x14a   : > { %v1683_v33 = vsel %vm306_vm10, %v636_v32, %v653_v25 }
 0x14b   : > { %v684_v37 = vpop.permute.xlu1 %683  ;;  %v667_v39 = vpop.permute.xlu0 %666 }
 0x14c   : > { %v673_v2 = vsel %vm672_vm15, %v667_v39, %v669_v19  ;;  %vm613_vm15 = vcmask 654336  }
 0x14d   : > { %783 = vrot.lane.b32.xlu0 %v1431_v0, %s1276_s11  ;;  %825 = vperm.xlu1 %1141, %v822_v35   ;;  %v677_v41 = vsel %vm255_vm9, %v673_v2, 0.0  ;;  %s1014_s11 = sshll.u32 %s1420_s6, 4 }
 0x14e   : > { %s200_s24 = scalar_lea.vmem [#allocation6], %s1014_s11 }
 0x14f   : > { %v682_v42 = vpop.permute.xlu1 %681  ;;  %v686_v44 = vpop.permute.xlu0 %685  ;;  %s927_s7 = sshll.u32 %s200_s24, 4  ;;  %s1754_s7 = int_to_ptr.vmem [resolvable:$true] %s927_s7 }
 0x150   : > { %v688_v48 = vsel %vm687_vm3, %v682_v42, %v684_v37  ;;  %v689_v50 = vsel %vm687_vm3, %v684_v37, %v686_v44  ;;  %vm707_vm3 = vcmask 424960   ;;  %s1177_s15 = scalar_lea.vmem %s1754_s7, 256  ;;  %p1184_p5 = scmp.lt.s32.totalorder %s1754_s7, %s1182_s23 }
 0x151   : > { %v1695_v3 = vsel %vm306_vm10, %v677_v41, %v688_v48  ;;  %v693_v53 = vsel %vm306_vm10, %v678_v1, %v689_v50  ;;  %v795_v48 = vld [vmem:[%s1802_s1] sm:$0xff]  ;;  %p1178_p8 = scmp.ne.s32.totalorder %s1754_s7, %s1177_s15  ;;  %p1185_p13 = scmp.lt.s32.totalorder %s1183_s28, %s1177_s15 }
 0x152   : > { %v1040_v54 = vpack.c.bf16 %v693_v53, %v1675_v29  ;;  %v1042_v0 = vpack.c.bf16 %v1695_v3, %v1683_v33 }
 0x153   : > { %v719_v55 = vpop.permute.xlu1 %718  ;;  %v717_v10 = vpop.permute.xlu0 %716  ;;  %p1179_p11 = pnand %p1178_p8, %p1812_p9  ;;  %p1186_p2 = por %p1185_p13, %p1184_p5 }
 0x154   : > { %v722_v13 = vsel %vm720_vm8, %v717_v10, %v719_v55 }
 0x155   : > { %v726_v19 = vsel %vm240_vm5, %v722_v13, 0.0  ;;  %p1180_p0 = pneg %p1179_p11 }
 0x156   : > { %v730_v22 = vrot.slane %v726_v19, 4 }
 0x157   : > { %v760_v57 = vpop.permute.xlu1 %759  ;;  %v758_v58 = vpop.permute.xlu0 %757  ;;  %p1187_p4 = pnand %p1186_p2, %p1180_p0 }
 0x19b   : > { %v403_v59 = vpop.permute.xlu1 %402  ;;  %v399_v60 = vpop.permute.xlu0 %398 }
 0x1a3   : > { %v608_v61 = vpop.permute.xlu1 %607  ;;  %v612_v5 = vpop.permute.xlu0 %611 }
 0x1a7   : > { %v756_v6 = vpop.permute.xlu1 %755  ;;  %v401_v7 = vpop.permute.xlu0 %400 }
 0x1a8   : > { %v405_v9 = vsel %vm404_vm4, %v399_v60, %v401_v7  ;;  %v406_v52 = vsel %vm404_vm4, %v401_v7, %v403_v59  ;;  %vm748_vm4 = vcmask 408576   ;;  %v762_v29 = vsel %vm761_vm12, %v756_v6, %v758_v58 }
 0x1a9   : > { %v1028_v11 = vpack.c.bf16 %v1576_v47, %v406_v52  ;;  %v1030_v12 = vpack.c.bf16 %v1573_v46, %v405_v9  ;;  %v763_v47 = vsel %vm761_vm12, %v758_v58, %v760_v57  ;;  %v766_v17 = vsel %vm255_vm9, %v762_v29, 0.0 }
 0x1aa   : > { %v767_v38 = vsel %vm256_vm7, %v763_v47, 0.0  ;;  %v770_v35 = vrot.slane %v766_v17, 4 }
 0x1ab   : > { %v706_v14 = vpop.permute.xlu1 %705  ;;  %v715_v18 = vpop.permute.xlu0 %714  ;;  %1029 = vmatprep.subr.bf16.mxu0 %v1028_v11  ;;  %v771_v26 = vrot.slane %v767_v38, 4 }
 0x1ac   : > { %1031 = vmatpush1.bf16.msra.mxu0 %v1030_v12  ;;  %v721_v56 = vsel %vm720_vm8, %v715_v18, %v717_v10 }
 0x1ad   : > { %1033 = vmatprep.subr.bf16.mxu0 %v1032_v20  ;;  %v725_v27 = vsel %vm239_vm11, %v721_v56, 0.0 }
 0x1ae   : > { %v729_v36 = vrot.slane %v725_v27, 4 }
 0x1af   : > { %v610_v21 = vpop.permute.xlu1 %609  ;;  %v704_v46 = vpop.permute.xlu0 %703 }
 0x1b0   : > { %v614_v23 = vsel %vm613_vm15, %v608_v61, %v610_v21  ;;  %v615_v24 = vsel %vm613_vm15, %v610_v21, %v612_v5  ;;  %v709_v25 = vsel %vm707_vm3, %v704_v46, %v706_v14  ;;  %1035 = vmatpush1.bf16.msra.mxu0 %v1034_v28 }
 0x1b1   : > { %v713_v8 = vsel %vm232_vm2, %v709_v25, 0.0  ;;  %v1036_v15 = vpack.c.bf16 %v615_v24, %v1654_v63  ;;  %v1038_v20 = vpack.c.bf16 %v614_v23, %v1657_v4 }
 0x1b2   : > { %v734_v30 = vsel %vm306_vm10, %v713_v8, %v730_v22 }
 0x1b3   : > { %v747_v31 = vpop.permute.xlu1 %746  ;;  %v745_v32 = vpop.permute.xlu0 %744  ;;  %1037 = vmatprep.subr.bf16.mxu0 %v1036_v15 }
 0x1b4   : > { %v750_v43 = vsel %vm748_vm4, %v745_v32, %v747_v31  ;;  %1039 = vmatpush1.bf16.msra.mxu0 %v1038_v20 }
 0x1b5   : > { %v754_v28 = vsel %vm248_vm13, %v750_v43, 0.0  ;;  %1041 = vmatprep.subr.bf16.mxu0 %v1040_v54 }
 0x1b6   : > { %v775_v63 = vsel %vm306_vm10, %v754_v28, %v771_v26 }
 0x1b7   : > { %v743_v4 = vpop.permute.xlu1 %742  ;;  %v702_v33 = vpop.permute.xlu0 %701  ;;  %v1044_v34 = vpack.c.bf16 %v775_v63, %v734_v30 }
 0x1b8   : > { %v749_v37 = vsel %vm748_vm4, %v743_v4, %v745_v32  ;;  %v708_v39 = vsel %vm707_vm3, %v702_v33, %v704_v46  ;;  %1043 = vmatpush1.bf16.msra.mxu0 %v1042_v0 }
 0x1b9   : > { %v753_v45 = vsel %vm247_vm14, %v749_v37, 0.0  ;;  %v712_v49 = vsel %vm231_vm1, %v708_v39, 0.0  ;;  %1045 = vmatprep.subr.bf16.mxu0 %v1044_v34 }
 0x1ba   : > { %v774_v51 = vsel %vm306_vm10, %v753_v45, %v770_v35  ;;  %v733_v40 = vsel %vm306_vm10, %v712_v49, %v729_v36 }
 0x1bb   : > { %v788_v2 = vpop.permute.xlu1 %787  ;;  %v786_v1 = vpop.permute.xlu0 %785  ;;  %v1046_v41 = vpack.c.bf16 %v774_v51, %v733_v40 }
 0x1bc   : > { %v790_v42 = vsel %vm596_vm6, %v786_v1, %v788_v2 }
 0x1bd   : > { %794 = vst [vmem:[#allocation2 + $0xc8] sm:$0xf] %v790_v42  ;;  %1047 = vmatpush1.bf16.msra.mxu0 %v1046_v41 }
 0x1bf   : > { %v784_v44 = vpop.permute.xlu0 %783 }
 0x1c0   : > { %v789_v62 = vsel %vm596_vm6, %v784_v44, %v786_v1 }
 0x1c1   : > { %793 = vst [vmem:[#allocation2 + $0xc0] sm:$0xf] %v789_v62 }
 0x1c4   : > { %v821_v16 = vld [vmem:[#allocation2 + $0xc8] sm:$0xf] }
 0x1c5   : > { %1015 = vmatprep.subr.msk.mxu0 %vm306_vm10, %v821_v16 }
 0x1c8   : > { %v820_v50 = vld [vmem:[#allocation2 + $0xc0] sm:$0xf] }
 0x1c9   : > { %1016 = vmatpush1.msk.msra.mxu0 %vm306_vm10, %v820_v50 }
 0x1ca   : > { %1017 = vmatmul.mubr.msk.f32.vlgmr.msra.gmra.mrb[0].mxu0 %vm371_vm0, %v795_v48 }
 0x1cc   : > { %v826_v3 = vpop.permute.xlu1 %825 }
 0x29d   : > { %v903_v53 = vpop.f32.mrb[0].mxu0 }
 0x29e   : > { %v904_v54 = vadd.f32 %v903_v53, %v826_v3  ;;  %v905_v0 = vpop.f32.mrb[1].mxu0 }
 0x29f   : > { %v906_v55 = vadd.f32 %v905_v0, %v826_v3 }
 0x2a0   : > { %908 = vst [vmem:[%s200_s24] sm:$0xff] %v904_v54 }
 0x2a1   : > { %909 = vst [vmem:[%s200_s24 + $0x8] sm:$0xff] %v906_v55 }
 0x2a2   : > { %1190 = shalt.err (!%p1187_p4)
}
 0x2a3   : > { %s1191_s6 = scalar_lea.hbm %s1752_s19, 256  ;;  %s1195_s30 = scalar_lea.hbm %s1804_s3, 512 }
 0x2a4   : > { %p1192_p6 = scmp.ne.s32.totalorder %s1752_s19, %s1191_s6  ;;  %p1196_p12 = scmp.lt.u32.totalorder %s1752_s19, %s1804_s3 }
 0x2a5   : > { %p1197_p1 = scmp.lt.u32.totalorder %s1195_s30, %s1191_s6  ;;  %p1199_p8 = scmp.lt.u32.totalorder %s1191_s6, %s1752_s19 }
 0x2a6   : > { %p1193_p7 = pnand %p1192_p6, %p1812_p9 }
 0x2a7   : > { %p1198_p3 = por %p1197_p1, %p1196_p12 }
 0x2a8   : > { %p1194_p10 = pneg %p1193_p7 }
 0x2a9   : > { %p1200_p11 = por %p1199_p8, %p1198_p3 }
 0x2ab   : > { %p1201_p0 = pnand %p1200_p11, %p1194_p10 }
 0x2ad   : > { %1204 = shalt.err (!%p1201_p0)
}
 0x2ae   : > { %1053 = dma.vmem_to_hbm [thread:$0]  (%p1812_p9), %s1754_s7, 256, %s1752_s19, %s911_s21  }
 0x2af PF: > { %s939_s11 = sand.u32 1, %s1239_s12   ;;  %p1813_p5 = scmp.ne.s32.totalorder %s1809_s27, 0 }
 0x2b0   : > { %p1814_p13 = scmp.ge.s32.totalorder %s1259_s17, 2  ;;  %s940_s4 = scalar_lea.sflag [#allocation5], %s939_s11 }
 0x2b2   : > { %p1060_p2 = pnand %p1814_p13, %p1813_p5 }
 0x2b4   : > { %1234 = dma.done.wait (!%p1060_p2), %s940_s4, 256  }
 0x2b5   : > { %1236 = vsyncadd (!%p1060_p2), %s940_s4, 4294967040  ;;  %s19_s17 = sadd.s32 1, %s1259_s17   ;;  %s1815_s12 = smov %s1243_s13 }
 0x2b6   : > { %p16_p4 = scmp.ge.s32.totalorder %s19_s17, 4   ;;  %s1816_s13 = smov %s1247_s14 }
 0x2b7   : > { %s1817_s14 = smov %s1367_s26  ;;  %s1818_s15 = smov %s1255_s16 }
 0x2b8   : > { %s1819_s16 = smov %s1821_s20  ;;  %18 = sbr.rel (!%p16_p4) target bundleno = 6 (0x6), region = 77 }
 0x2bf   :  { %945 = vsyncpa [#allocation4], 1 }
 0x2c0   :  { %947 = vsyncpa [#allocation4 + $0x1], 1 }
 0x2c1   :  { %948 = vsyncpa [#allocation5], 1 }
 0x2c2   :  { %950 = vsyncpa [#allocation5 + $0x1], 1 }

// kernel: tpu_custom_call.1
= control target key start
LH: loop header
LB: loop body
LE: loop exit
PB: predicated region body
PF: predicated region fallthrough
CT: control target
= control target key end

     0   :  { %8 = vsyncpa [#allocation4], 0  ;;  %s1801_s0 = inlined_call_operand.hbm [shape: f32[2,4,336], index: 0, kind: input, shape index: {}]   ;;  %s1802_s1 = inlined_call_operand.vmem [shape: f32[8,100], index: 1, kind: input, shape index: {}]   ;;  %s1803_s2 = inlined_call_operand.vmem [shape: f32[8,1], index: 2, kind: input, shape index: {}]   ;;  %s1804_s3 = inlined_call_operand.hbm [shape: f32[2,8,256], index: 3, kind: output, shape index: {}]  }
   0x1   :  { %10 = vsyncpa [#allocation4 + $0x1], 0 }
   0x2   :  { %11 = vsyncpa [#allocation5], 0 }
   0x3   :  { %13 = vsyncpa [#allocation5 + $0x1], 0  ;;  %s1311_s12 = smov 0   ;;  %s1313_s13 = smov 0  }
   0x4   :  { %s1315_s14 = smov 0   ;;  %s1317_s15 = smov 0  }
   0x5   :  { %s1319_s16 = smov 0   ;;  %s1321_s17 = smov 0  }
   0x6 LB: > { %s1008_s18 = sadd.s32 4294967295, %s1259_s17   ;;  %s1009_s19 = sadd.s32 4294967294, %s1259_s17   ;;  %s1259_s17 = sphi %s1321_s17, %s19_s17   ;;  %s1255_s16 = sphi %s1319_s16, %s1819_s16   ;;  %s1251_s15 = sphi %s1317_s15, %s1818_s15   ;;  %s1247_s14 = sphi %s1315_s14, %s1817_s14   ;;  %s1243_s13 = sphi %s1313_s13, %s1816_s13   ;;  %s1239_s12 = sphi %s1311_s12, %s1815_s12  }
   0x7   : > { %s31_s20 = sadd.s32 1, %s1255_s16  ;;  %s38_s21 = sadd.s32 1, %s1247_s14 }
   0x8   : > { %p33_p0 = scmp.ge.s32.totalorder %s31_s20, 2  ;;  %p45_p1 = scmp.ne.s32.totalorder %s1247_s14, %s1243_s13 }
   0x9   : > { %p46_p2 = scmp.eq.s32.totalorder %s1259_s17, 0  ;;  %p51_p3 = scmp.ne.s32.totalorder %s1243_s13, %s1239_s12 }
   0xa   : > { %s1821_s20 = smov (%p33_p0, %s31_s20), 0  ;;  %p52_p5 = scmp.eq.s32.totalorder %s1008_s18, 0 }
   0xb   : > { %p1352_p4 = por %p46_p2, %p45_p1  ;;  %s35_s23 = ssub.s32 %s1255_s16, %s1821_s20 }
   0xc   : > { %p119_p6 = scmp.eq.s32.totalorder %s1008_s18, 1  ;;  %p36_p7 = scmp.eq.s32.totalorder %s35_s23, 0 }
   0xd   : > { %p1358_p8 = por %p52_p5, %p51_p3  ;;  %p125_p10 = scmp.eq.s32.totalorder %s1009_s19, 1 }
   0xe   : > { %p1362_p9 = por %p119_p6, %p45_p1  ;;  %p1063_p13 = scmp.lt.s32.totalorder %s1259_s17, 2 }
   0xf   : > { %s1367_s26 = scalar_select %p36_p7, %s1247_s14, %s38_s21  }
  0x10   : > { %s1808_s25 = scalar_select %p1362_p9, 1, 0 }
  0x11   : > { %p1369_p11 = por %p125_p10, %p51_p3  ;;  %s151_s28 = sand.u32 1, %s1247_s14  }
  0x12   : > { %s1048_s29 = smul.u32 12, %s151_s28  ;;  %p1379_p0 = pnand %p1063_p13, %p1352_p4 }
  0x13   : > { %s1809_s27 = scalar_select %p1369_p11, 1, 0 }
  0x14   : > { %s1049_s30 = smul.u32 192, %s1255_s16  ;;  %s155_s8 = scalar_lea.vmem [#allocation3], %s1048_s29 }
  0x15   : > { %s163_s9 = sshll.u32 %s155_s8, 4  ;;  %s152_s10 = scalar_lea.sflag [#allocation4], %s151_s28  ;;  %s1389_s9 = int_to_ptr.vmem [resolvable:$true] %s163_s9 }
  0x16   : > { %s1387_s7 = scalar_lea.hbm %s1801_s0, %s1049_s30  ;;  %p1149_p3 = pneg %p1379_p0 }
  0x17   : > { %s1147_s11 = scalar_lea.hbm %s1387_s7, 192  ;;  %s1152_s21 = scalar_lea.hbm %s1801_s0, 384 }
  0x18   : > { %p1148_p2 = scmp.ne.s32.totalorder %s1387_s7, %s1147_s11  ;;  %p1153_p6 = scmp.lt.u32.totalorder %s1387_s7, %s1801_s0 }
  0x19   : > { %p1154_p7 = scmp.lt.u32.totalorder %s1152_s21, %s1147_s11  ;;  %p1156_p13 = scmp.lt.u32.totalorder %s1147_s11, %s1387_s7 }
  0x1a   : > { %p1150_p4 = pnand %p1149_p3, %p1148_p2 }
  0x1b   : > { %p1155_p10 = por %p1154_p7, %p1153_p6 }
  0x1c   : > { %p1151_p5 = pneg %p1150_p4 }
  0x1d   : > { %p1157_p12 = por %p1156_p13, %p1155_p10 }
  0x1f   : > { %p1158_p1 = pnand %p1157_p12, %p1151_p5 }
  0x21   : > { %1161 = shalt.err (!%p1158_p1)
}
  0x22   : > { %s1162_s28 = scalar_lea.vmem %s1389_s9, 192  ;;  %s1261_s29 = smov [#allocation3]  }
  0x23   : > { %p1163_p2 = scmp.ne.s32.totalorder %s1389_s9, %s1162_s28  ;;  %s1167_s30 = sshll.u32 %s1261_s29, 4  ;;  %s1168_s30 = int_to_ptr.vmem [resolvable:$false] %s1167_s30 }
  0x24   : > { %s1169_s5 = scalar_lea.vmem %s1168_s30, 384  ;;  %p1170_p9 = scmp.lt.s32.totalorder %s1389_s9, %s1168_s30 }
  0x25   : > { %p1165_p4 = pnand %p1163_p2, %p1149_p3  ;;  %p1171_p6 = scmp.lt.s32.totalorder %s1169_s5, %s1162_s28 }
  0x27   : > { %p1166_p11 = pneg %p1165_p4  ;;  %p1172_p7 = por %p1171_p6, %p1170_p9 }
  0x29   : > { %p1173_p10 = pnand %p1172_p7, %p1166_p11 }
  0x2b   : > { %1176 = shalt.err (!%p1173_p10)
}
  0x2c   : > { %1058 = dma.hbm_to_vmem [thread:$0]  (!%p1379_p0), %s1387_s7, 192, %s1389_s9, %s152_s10  }
  0x2d   : > { %p168_p12 = scmp.lt.s32.totalorder %s1259_s17, 3  ;;  %p1811_p1 = scmp.ge.s32.totalorder %s1259_s17, 1 }
  0x2f   : > { %p169_p3 = pnand %p1811_p1, %p168_p12 }
  0x30   : > { %s1420_s6 = sand.u32 (!%p169_p3), 1, %s1243_s13  }
  0x31   : > { %172 = sbr.rel (%p169_p3) target bundleno = 687 (0x2af), region = 32  ;;  %s175_s11 = scalar_lea.sflag (!%p169_p3), [#allocation4], %s1420_s6 }
  0x32   : > { %s1050_s8 = smul.u32 (!%p169_p3), 12, %s1420_s6 }
  0x34   : > { %s1424_s18 = scalar_lea.vmem (!%p169_p3), [#allocation3], %s1050_s8 }
  0x38   : > { %1230 = dma.done.wait (%p1358_p8), %s175_s11, 192  }
  0x39   : > { %1232 = vsyncadd (%p1358_p8), %s175_s11, 4294967104  ;;  %v1431_v0 = vld [vmem:[%s1424_s18] sm:$0xff]  ;;  %v1434_v1 = vld [vmem:[%s1424_s18 + $0x8] sm:$0xf]  ;;  %s1262_s4 = smov 100   ;;  %s1263_s24 = smov 68   ;;  %v202_v11 = vlaneseq }
  0x3a   : > { %365 = vrot.lane.b32.xlu0 %v1431_v0, %s1262_s4  ;;  %369 = vrot.lane.b32.xlu1 %v1434_v1, %s1262_s4  ;;  %v1440_v2 = vcombine.high %v1431_v0, %v1431_v0  ;;  %v1445_v3 = vld [vmem:[%s1424_s18 + $0x8] sm:$0xf]  ;;  %s1264_s7 = smov 115   ;;  %s1265_s9 = smov 113   ;;  %v1474_v10 = vcombine.low %v1431_v0, %v1431_v0  ;;  %vm371_vm0 = vcmask 818176   ;;  %vm580_vm3 = vcmask 556032  }
  0x3b   : > { %v262_v4 = vld [vmem:[%s1424_s18 + $0x8] sm:$0xf]  ;;  %s1266_s10 = smov 116   ;;  %s1267_s19 = smov 114   ;;  %v203_v12 = vand.u32 127, %v202_v11  ;;  %vm293_vm4 = vcmask 941056  }
  0x3c   : > { %v312_v5 = vld [vmem:[%s1424_s18 + $0x8] sm:$0xf]  ;;  %s1268_s21 = smov 98   ;;  %s1269_s22 = smov 99   ;;  %vm343_vm6 = vcmask 924672   ;;  %vm276_vm8 = vcmask 949248  }
  0x3d   : > { %v412_v6 = vld [vmem:[%s1424_s18 + $0x8] sm:$0xf]  ;;  %s1270_s23 = smov 83   ;;  %s1271_s28 = smov 97   ;;  %v204_v13 = vadd.s32 128, %v203_v12  ;;  %v1478_v14 = vand.u32 15, %v203_v12 }
  0x3e   : > { %367 = vrot.lane.b32.xlu0 %v1440_v2, %s1262_s4  ;;  %574 = vrot.lane.b32.xlu1 %v1431_v0, %s1263_s24  ;;  %v488_v7 = vld [vmem:[%s1424_s18 + $0x8] sm:$0xf]  ;;  %s1272_s29 = smov 84   ;;  %s1273_s30 = smov 96   ;;  %vm306_vm10 = vcmask 1043456   ;;  %vm326_vm12 = vcmask 932864  }
  0x3f   : > { %v453_v8 = vld [vmem:[%s1424_s18 + $0x8] sm:$0xf]  ;;  %v216_v15 = vand.u32 15, %v204_v13  ;;  %v1481_v16 = vadd.s32 4294967292, %v1478_v14  ;;  %s1274_s5 = smov 16   ;;  %s1275_s8 = smov 81  }
  0x40   : > { %v471_v9 = vcombine.low %v453_v8, %v453_v8  ;;  %v529_v33 = vld [vmem:[%s1424_s18 + $0x8] sm:$0xf]  ;;  %s1276_s11 = smov 48   ;;  %v1510_v45 = vadd.s32 4294967295, %v1478_v14  ;;  %s1277_s4 = smov 82   ;;  %v1517_v49 = vadd.s32 4294967293, %v1478_v14 }
  0x41   : > { %v1483_v17 = vadd.s32 4294967292, %v216_v15  ;;  %vm231_vm1 = vcmp.ge.s32.totalorder %v1481_v16, 0  ;;  %v1499_v38 = vadd.s32 4294967293, %v216_v15  ;;  %v1505_v43 = vadd.s32 4294967295, %v216_v15  ;;  %v621_v59 = vld [vmem:[%s1424_s18 + $0x8] sm:$0xf] }
  0x42   : > { %576 = vrot.lane.b32.xlu0 %v1440_v2, %s1263_s24  ;;  %578 = vrot.lane.b32.xlu1 %v1445_v3, %s1263_s24  ;;  %v1519_v51 = vadd.s32 4294967294, %v216_v15  ;;  %vm255_vm9 = vcmp.ge.s32.totalorder %v1510_v45, 0  ;;  %vm239_vm11 = vcmp.ge.s32.totalorder %v1517_v49, 0  ;;  %v1535_v62 = vadd.s32 4294967294, %v1478_v14  ;;  %s1278_s24 = smov 66   ;;  %p1812_p9 = scmp.ne.s32.totalorder %s1808_s25, 0 }
  0x43   : > { %vm232_vm2 = vcmp.ge.s32.totalorder %v1483_v17, 0  ;;  %vm240_vm5 = vcmp.ge.s32.totalorder %v1499_v38, 0  ;;  %vm256_vm7 = vcmp.ge.s32.totalorder %v1505_v43, 0  ;;  %vm435_vm15 = vcmask 801792  }
  0x44   : > { %vm248_vm13 = vcmp.ge.s32.totalorder %v1519_v51, 0  ;;  %vm247_vm14 = vcmp.ge.s32.totalorder %v1535_v62, 0 }
  0x46   : > { %291 = vrot.lane.b32.xlu1 %v262_v4, %s1264_s7  ;;  %289 = vrot.lane.b32.xlu0 %v1440_v2, %s1264_s7 }
  0x4a   : > { %341 = vrot.lane.b32.xlu1 %v312_v5, %s1265_s9  ;;  %339 = vrot.lane.b32.xlu0 %v1440_v2, %s1265_s9 }
  0x4e   : > { %337 = vrot.lane.b32.xlu1 %v1431_v0, %s1265_s9  ;;  %287 = vrot.lane.b32.xlu0 %v1431_v0, %s1264_s7  ;;  %s1279_s7 = smov 67   ;;  %s1280_s9 = smov 65  }
  0x52   : > { %274 = vrot.lane.b32.xlu1 %v262_v4, %s1266_s10  ;;  %272 = vrot.lane.b32.xlu0 %v1440_v2, %s1266_s10 }
  0x56   : > { %324 = vrot.lane.b32.xlu1 %v312_v5, %s1267_s19  ;;  %322 = vrot.lane.b32.xlu0 %v1440_v2, %s1267_s19 }
  0x5a   : > { %320 = vrot.lane.b32.xlu1 %v1431_v0, %s1267_s19  ;;  %270 = vrot.lane.b32.xlu0 %v1431_v0, %s1266_s10  ;;  %s1281_s10 = smov 64   ;;  %s1282_s19 = smov 51  }
  0x5e   : > { %433 = vrot.lane.b32.xlu1 %v412_v6, %s1268_s21  ;;  %431 = vrot.lane.b32.xlu0 %v1440_v2, %s1268_s21 }
  0x62   : > { %418 = vrot.lane.b32.xlu1 %v1440_v2, %s1269_s22  ;;  %429 = vrot.lane.b32.xlu0 %v1431_v0, %s1268_s21  ;;  %s1283_s21 = smov 49  }
  0x66   : > { %416 = vrot.lane.b32.xlu1 %v1431_v0, %s1269_s22  ;;  %420 = vrot.lane.b32.xlu0 %v412_v6, %s1269_s22  ;;  %s1284_s22 = smov 112  }
  0x6a   : > { %509 = vrot.lane.b32.xlu1 %v488_v7, %s1270_s23  ;;  %507 = vrot.lane.b32.xlu0 %v1440_v2, %s1270_s23 }
  0x6e   : > { %505 = vrot.lane.b32.xlu1 %v1431_v0, %s1270_s23  ;;  %459 = vrot.lane.b32.xlu0 %v1440_v2, %s1271_s28  ;;  %s1285_s23 = smov 80  }
  0x72   : > { %461 = vrot.lane.b32.xlu1 %v453_v8, %s1271_s28  ;;  %494 = vrot.lane.b32.xlu0 %v1440_v2, %s1272_s29 }
  0x76   : > { %496 = vrot.lane.b32.xlu1 %v488_v7, %s1272_s29  ;;  %457 = vrot.lane.b32.xlu0 %v1431_v0, %s1271_s28  ;;  %s1286_s28 = smov 52  }
  0x7a   : > { %474 = vrot.lane.b32.xlu1 %v1431_v0, %s1273_s30  ;;  %476 = vrot.lane.b32.xlu0 %v471_v9, %s1273_s30 }
  0x7e   : > { %492 = vrot.lane.b32.xlu1 %v1431_v0, %s1272_s29  ;;  %472 = vrot.lane.b32.xlu0 %v1474_v10, %s1273_s30  ;;  %s1287_s29 = smov 50  }
  0xac   : > { %v366_v18 = vpop.permute.xlu0 %365  ;;  %v370_v19 = vpop.permute.xlu1 %369 }
  0xb0   : > { %v368_v20 = vpop.permute.xlu0 %367  ;;  %v575_v21 = vpop.permute.xlu1 %574 }
  0xb1   : > { %v372_v22 = vsel %vm371_vm0, %v366_v18, %v368_v20  ;;  %v373_v23 = vsel %vm371_vm0, %v368_v20, %v370_v19 }
  0xb2   : > { %v376_v24 = vsel %vm231_vm1, %v372_v22, 0.0  ;;  %v377_v25 = vsel %vm232_vm2, %v373_v23, 0.0 }
  0xb3   : > { %v381_v26 = vrot.slane %v376_v24, 4  ;;  %v382_v27 = vrot.slane %v377_v25, 4 }
  0xb4   : > { %v577_v28 = vpop.permute.xlu0 %576  ;;  %v579_v29 = vpop.permute.xlu1 %578 }
  0xb5   : > { %v581_v30 = vsel %vm580_vm3, %v575_v21, %v577_v28  ;;  %385 = vrot.lane.b32.xlu1 %v382_v27, %s1274_s5  ;;  %383 = vrot.lane.b32.xlu0 %v381_v26, %s1274_s5  ;;  %v582_v31 = vsel %vm580_vm3, %v577_v28, %v579_v29  ;;  %v662_v28 = vld [vmem:[%s1424_s18 + $0x8] sm:$0xf]  ;;  %vm422_vm3 = vcmask 809984  }
  0xb6   : > { %v586_v32 = vsel %vm232_vm2, %v582_v31, 0.0  ;;  %v585_v34 = vsel %vm231_vm1, %v581_v30, 0.0 }
  0xb7   : > { %v591_v37 = vrot.slane %v586_v32, 4  ;;  %v590_v39 = vrot.slane %v585_v34, 4 }
  0xb8   : > { %v292_v35 = vpop.permute.xlu1 %291  ;;  %v290_v36 = vpop.permute.xlu0 %289 }
  0xb9   : > { %548 = vrot.lane.b32.xlu1 %v1440_v2, %s1275_s8  ;;  %550 = vrot.lane.b32.xlu0 %v529_v33, %s1275_s8  ;;  %v295_v42 = vsel %vm293_vm4, %v290_v36, %v292_v35 }
  0xba   : > { %v299_v44 = vsel %vm240_vm5, %v295_v42, 0.0 }
  0xbb   : > { %v303_v50 = vrot.slane %v299_v44, 4 }
  0xbc   : > { %v342_v40 = vpop.permute.xlu1 %341  ;;  %v340_v41 = vpop.permute.xlu0 %339 }
  0xbd   : > { %594 = vrot.lane.b32.xlu1 %v591_v37, %s1276_s11  ;;  %592 = vrot.lane.b32.xlu0 %v590_v39, %s1276_s11  ;;  %v345_v48 = vsel %vm343_vm6, %v340_v41, %v342_v40 }
  0xbe   : > { %v349_v52 = vsel %vm256_vm7, %v345_v48, 0.0 }
  0xbf   : > { %v353_v60 = vrot.slane %v349_v52, 4  ;;  %v1580_v52 = vld [vmem:[%s1424_s18 + $0x8] sm:$0xf] }
  0xc0   : > { %v338_v46 = vpop.permute.xlu1 %337  ;;  %v288_v47 = vpop.permute.xlu0 %287 }
  0xc1   : > { %546 = vrot.lane.b32.xlu1 %v1431_v0, %s1275_s8  ;;  %535 = vrot.lane.b32.xlu0 %v1440_v2, %s1277_s4  ;;  %v344_v55 = vsel %vm343_vm6, %v338_v46, %v340_v41  ;;  %v294_v56 = vsel %vm293_vm4, %v288_v47, %v290_v36  ;;  %v680_v41 = vcombine.low %v662_v28, %v662_v28  ;;  %vm511_vm4 = vcmask 678912  }
  0xc2   : > { %v348_v63 = vsel %vm255_vm9, %v344_v55, 0.0  ;;  %v298_v4 = vsel %vm239_vm11, %v294_v56, 0.0  ;;  %v1588_v56 = vld [vmem:[%s1424_s18 + $0x8] sm:$0xf]  ;;  %vm463_vm6 = vcmask 793600  }
  0xc3   : > { %v352_v9 = vrot.slane %v348_v63, 4  ;;  %v302_v11 = vrot.slane %v298_v4, 4 }
  0xc4   : > { %v275_v53 = vpop.permute.xlu1 %274  ;;  %v273_v54 = vpop.permute.xlu0 %272 }
  0xc5   : > { %537 = vrot.lane.b32.xlu1 %v529_v33, %s1277_s4  ;;  %533 = vrot.lane.b32.xlu0 %v1431_v0, %s1277_s4  ;;  %v278_v57 = vsel %vm276_vm8, %v273_v54, %v275_v53  ;;  %s1023_s4 = sshll.u32 %s1251_s15, 8 }
  0xc6   : > { %v282_v58 = vsel %vm232_vm2, %v278_v57, 0.0 }
  0xc7   : > { %v308_v61 = vsel %vm306_vm10, %v282_v58, %v303_v50 }
  0xc8   : > { %v325_v5 = vpop.permute.xlu1 %324  ;;  %v323_v6 = vpop.permute.xlu0 %322 }
  0xc9   : > { %v328_v7 = vsel %vm326_vm12, %v323_v6, %v325_v5  ;;  %640 = vrot.lane.b32.xlu1 %v1440_v2, %s1278_s24  ;;  %642 = vrot.lane.b32.xlu0 %v621_v59, %s1278_s24 }
  0xca   : > { %v332_v8 = vsel %vm248_vm13, %v328_v7, 0.0 }
  0xcb   : > { %v357_v12 = vsel %vm306_vm10, %v332_v8, %v353_v60 }
  0xcc   : > { %v321_v13 = vpop.permute.xlu1 %320  ;;  %v271_v14 = vpop.permute.xlu0 %270  ;;  %v1024_v15 = vpack.c.bf16 %v357_v12, %v308_v61 }
  0xcd   : > { %v327_v18 = vsel %vm326_vm12, %v321_v13, %v323_v6  ;;  %v277_v19 = vsel %vm276_vm8, %v271_v14, %v273_v54  ;;  %627 = vrot.lane.b32.xlu1 %v1440_v2, %s1279_s7  ;;  %638 = vrot.lane.b32.xlu0 %v1431_v0, %s1278_s24  ;;  %vm498_vm8 = vcmask 687104   ;;  %vm478_vm12 = vcmask 785408  }
  0xce   : > { %v331_v20 = vsel %vm247_vm14, %v327_v18, 0.0  ;;  %v281_v21 = vsel %vm231_vm1, %v277_v19, 0.0  ;;  %1025 = vmatprep.subr.bf16.mxu0 %v1024_v15 }
  0xcf   : > { %v356_v22 = vsel %vm306_vm10, %v331_v20, %v352_v9  ;;  %v307_v23 = vsel %vm306_vm10, %v281_v21, %v302_v11 }
  0xd0   : > { %v434_v24 = vpop.permute.xlu1 %433  ;;  %v432_v25 = vpop.permute.xlu0 %431  ;;  %v1026_v26 = vpack.c.bf16 %v356_v22, %v307_v23 }
  0xd1   : > { %v437_v27 = vsel %vm435_vm15, %v432_v25, %v434_v24  ;;  %668 = vrot.lane.b32.xlu1 %v1440_v2, %s1280_s9  ;;  %629 = vrot.lane.b32.xlu0 %v621_v59, %s1279_s7 }
  0xd2   : > { %1027 = vmatpush1.bf16.msra.mxu0 %v1026_v26  ;;  %v441_v29 = vsel %vm248_vm13, %v437_v27, 0.0 }
  0xd3   : > { %v445_v34 = vrot.slane %v441_v29, 4 }
  0xd4   : > { %v419_v30 = vpop.permute.xlu1 %418  ;;  %v430_v31 = vpop.permute.xlu0 %429 }
  0xd5   : > { %v436_v32 = vsel %vm435_vm15, %v430_v31, %v432_v25  ;;  %625 = vrot.lane.b32.xlu1 %v1431_v0, %s1279_s7  ;;  %670 = vrot.lane.b32.xlu0 %v662_v28, %s1280_s9  ;;  %vm387_vm15 = vcmask 130048  }
  0xd6   : > { %v440_v33 = vsel %vm247_vm14, %v436_v32, 0.0 }
  0xd7   : > { %v444_v35 = vrot.slane %v440_v33, 4 }
  0xd8   : > { %v417_v36 = vpop.permute.xlu1 %416  ;;  %v421_v37 = vpop.permute.xlu0 %420 }
  0xd9   : > { %v423_v39 = vsel %vm422_vm3, %v417_v36, %v419_v30  ;;  %v424_v40 = vsel %vm422_vm3, %v419_v30, %v421_v37  ;;  %683 = vrot.lane.b32.xlu1 %v1431_v0, %s1281_s10  ;;  %666 = vrot.lane.b32.xlu0 %v1431_v0, %s1280_s9  ;;  %vm552_vm3 = vcmask 662528  }
  0xda   : > { %v427_v42 = vsel %vm239_vm11, %v423_v39, 0.0  ;;  %v428_v44 = vsel %vm240_vm5, %v424_v40, 0.0 }
  0xdb   : > { %v1573_v46 = vsel %vm306_vm10, %v427_v42, %v444_v35  ;;  %v1576_v47 = vsel %vm306_vm10, %v428_v44, %v445_v34 }
  0xdc   : > { %v510_v48 = vpop.permute.xlu1 %509  ;;  %v508_v50 = vpop.permute.xlu0 %507 }
  0xdd   : > { %681 = vrot.lane.b32.xlu1 %v1474_v10, %s1281_s10  ;;  %685 = vrot.lane.b32.xlu0 %v680_v41, %s1281_s10  ;;  %v513_v55 = vsel %vm511_vm4, %v508_v50, %v510_v48 }
  0xde   : > { %v517_v10 = vsel %vm240_vm5, %v513_v55, 0.0 }
  0xdf   : > { %v521_v59 = vrot.slane %v517_v10, 4 }
  0xe0   : > { %v506_v53 = vpop.permute.xlu1 %505  ;;  %v460_v54 = vpop.permute.xlu0 %459 }
  0xe1   : > { %718 = vrot.lane.b32.xlu1 %v1580_v52, %s1282_s19  ;;  %716 = vrot.lane.b32.xlu0 %v1440_v2, %s1282_s19  ;;  %v512_v4 = vsel %vm511_vm4, %v506_v53, %v508_v50  ;;  %vm539_vm4 = vcmask 670720  }
  0xe2   : > { %v516_v9 = vsel %vm239_vm11, %v512_v4, 0.0 }
  0xe3   : > { %v520_v18 = vrot.slane %v516_v9, 4 }
  0xe4   : > { %v462_v57 = vpop.permute.xlu1 %461  ;;  %v495_v58 = vpop.permute.xlu0 %494 }
  0xe5   : > { %759 = vrot.lane.b32.xlu1 %v1588_v56, %s1283_s21  ;;  %757 = vrot.lane.b32.xlu0 %v1440_v2, %s1283_s21  ;;  %v465_v60 = vsel %vm463_vm6, %v460_v54, %v462_v57 }
  0xe6   : > { %v469_v7 = vsel %vm256_vm7, %v465_v60, 0.0 }
  0xe8   : > { %v497_v61 = vpop.permute.xlu1 %496  ;;  %v458_v63 = vpop.permute.xlu0 %457 }
  0xe9   : > { %v500_v5 = vsel %vm498_vm8, %v495_v58, %v497_v61  ;;  %v464_v11 = vsel %vm463_vm6, %v458_v63, %v460_v54  ;;  %vm596_vm6 = vcmask 392192  }
  0xea   : > { %v504_v6 = vsel %vm232_vm2, %v500_v5, 0.0  ;;  %v468_v19 = vsel %vm255_vm9, %v464_v11, 0.0 }
  0xeb   : > { %v1604_v8 = vsel %vm306_vm10, %v504_v6, %v521_v59 }
  0xec   : > { %v475_v12 = vpop.permute.xlu1 %474  ;;  %v477_v13 = vpop.permute.xlu0 %476 }
  0xed   : > { %v480_v14 = vsel %vm478_vm12, %v475_v12, %v477_v13 }
  0xee   : > { %v1610_v15 = vsel %vm306_vm10, %v469_v7, %v480_v14 }
  0xef   : > { %v1032_v20 = vpack.c.bf16 %v1604_v8, %v1610_v15 }
  0xf0   : > { %v493_v21 = vpop.permute.xlu1 %492  ;;  %v473_v22 = vpop.permute.xlu0 %472 }
  0xf1   : > { %v499_v23 = vsel %vm498_vm8, %v493_v21, %v495_v58  ;;  %v479_v24 = vsel %vm478_vm12, %v473_v22, %v475_v12  ;;  %vm644_vm8 = vcmask 539648   ;;  %vm631_vm12 = vcmask 547840  }
  0xf2   : > { %v503_v25 = vsel %vm231_vm1, %v499_v23, 0.0  ;;  %v1620_v26 = vsel %vm306_vm10, %v468_v19, %v479_v24  ;;  %v779_v24 = vld [vmem:[%s1424_s18 + $0x8] sm:$0xf] }
  0xf3   : > { %v1623_v27 = vsel %vm306_vm10, %v503_v25, %v520_v18 }
  0xf4   : > { %v1034_v28 = vpack.c.bf16 %v1623_v27, %v1620_v26 }
 0x127   : > { %v386_v29 = vpop.permute.xlu1 %385  ;;  %v384_v30 = vpop.permute.xlu0 %383 }
 0x128   : > { %v394_v31 = vsel %vm306_vm10, %v1434_v1, %v386_v29  ;;  %v392_v32 = vsel %vm306_vm10, %v1431_v0, %v384_v30  ;;  %v388_v40 = vsel %vm387_vm15, %v384_v30, %v386_v29  ;;  %vm672_vm15 = vcmask 531456  }
 0x129   : > { %402 = vrot.lane.b32.xlu1 %v394_v31, %s1284_s22  ;;  %398 = vrot.lane.b32.xlu0 %v392_v32, %s1284_s22  ;;  %v393_v48 = vsel %vm306_vm10, %v1440_v2, %v388_v40  ;;  %v1289_v40 = vmov 0  }
 0x12a   : > { %1141 = vset.pattern.permute.xlu1 %v1289_v40  ;;  %1142 = vset.pattern.permute.xlu0 %v1289_v40 }
 0x12b   : > { %v549_v33 = vpop.permute.xlu1 %548  ;;  %v551_v34 = vpop.permute.xlu0 %550 }
 0x12c   : > { %v554_v1 = vsel %vm552_vm3, %v549_v33, %v551_v34  ;;  %v1288_v34 = vmov 0.0  }
 0x12d   : > { %v558_v50 = vsel %vm256_vm7, %v554_v1, 0.0  ;;  %901 = vmatprep.mubr.f32.mxu0 %v1288_v34 }
 0x12e   : > { %v562_v55 = vrot.slane %v558_v50, 4 }
 0x12f   : > { %v595_v35 = vpop.permute.xlu1 %594  ;;  %v593_v36 = vpop.permute.xlu0 %592 }
 0x130   : > { %v603_v37 = vsel %vm306_vm10, %v1445_v3, %v595_v35  ;;  %v601_v39 = vsel %vm306_vm10, %v1431_v0, %v593_v36  ;;  %v597_v59 = vsel %vm596_vm6, %v593_v36, %v595_v35  ;;  %v822_v35 = vld [vmem:[%s1803_s2] sm:$0xff] }
 0x131   : > { %611 = vrot.lane.b32.xlu0 %v603_v37, %s1285_s23  ;;  %607 = vrot.lane.b32.xlu1 %v601_v39, %s1285_s23  ;;  %v602_v7 = vsel %vm306_vm10, %v1440_v2, %v597_v59 }
 0x133   : > { %v547_v41 = vpop.permute.xlu1 %546  ;;  %v536_v42 = vpop.permute.xlu0 %535 }
 0x134   : > { %v553_v44 = vsel %vm552_vm3, %v547_v41, %v549_v33  ;;  %vm687_vm3 = vcmask 523264  }
 0x135   : > { %v557_v3 = vsel %vm255_vm9, %v553_v44, 0.0  ;;  %400 = vrot.lane.b32.xlu0 %v393_v48, %s1284_s22  ;;  %755 = vrot.lane.b32.xlu1 %v1431_v0, %s1283_s21  ;;  %s911_s21 = scalar_lea.sflag [#allocation5], %s1420_s6  ;;  %s1290_s22 = smov [#allocation6]  }
 0x136   : > { %v561_v10 = vrot.slane %v557_v3, 4 }
 0x137   : > { %v538_v53 = vpop.permute.xlu1 %537  ;;  %v534_v54 = vpop.permute.xlu0 %533 }
 0x138   : > { %v541_v57 = vsel %vm539_vm4, %v536_v42, %v538_v53  ;;  %v540_v58 = vsel %vm539_vm4, %v534_v54, %v536_v42  ;;  %vm404_vm4 = vcmask 916480  }
 0x139   : > { %v545_v60 = vsel %vm248_vm13, %v541_v57, 0.0  ;;  %v544_v61 = vsel %vm247_vm14, %v540_v58, 0.0  ;;  %714 = vrot.lane.b32.xlu0 %v1431_v0, %s1282_s19  ;;  %705 = vrot.lane.b32.xlu1 %v1580_v52, %s1286_s28  ;;  %s1752_s19 = scalar_lea.hbm %s1804_s3, %s1023_s4 }
 0x13a   : > { %v1654_v63 = vsel %vm306_vm10, %v545_v60, %v562_v55  ;;  %v1657_v4 = vsel %vm306_vm10, %v544_v61, %v561_v10 }
 0x13b   : > { %v641_v5 = vpop.permute.xlu1 %640  ;;  %v643_v6 = vpop.permute.xlu0 %642 }
 0x13c   : > { %v646_v9 = vsel %vm644_vm8, %v641_v5, %v643_v6 }
 0x13d   : > { %703 = vrot.lane.b32.xlu0 %v1440_v2, %s1286_s28  ;;  %609 = vrot.lane.b32.xlu1 %v602_v7, %s1285_s23  ;;  %v650_v52 = vsel %vm248_vm13, %v646_v9, 0.0  ;;  %s1181_s23 = sshll.u32 %s1290_s22, 4  ;;  %s1182_s23 = int_to_ptr.vmem [resolvable:$false] %s1181_s23 }
 0x13e   : > { %v654_v14 = vrot.slane %v650_v52, 4 }
 0x13f   : > { %v628_v11 = vpop.permute.xlu1 %627  ;;  %v639_v12 = vpop.permute.xlu0 %638 }
 0x140   : > { %v645_v13 = vsel %vm644_vm8, %v639_v12, %v641_v5  ;;  %vm720_vm8 = vcmask 416768  }
 0x141   : > { %744 = vrot.lane.b32.xlu0 %v1440_v2, %s1287_s29  ;;  %746 = vrot.lane.b32.xlu1 %v1588_v56, %s1287_s29  ;;  %v649_v18 = vsel %vm247_vm14, %v645_v13, 0.0 }
 0x142   : > { %v653_v25 = vrot.slane %v649_v18, 4 }
 0x143   : > { %v669_v19 = vpop.permute.xlu1 %668  ;;  %v630_v21 = vpop.permute.xlu0 %629 }
 0x144   : > { %v633_v22 = vsel %vm631_vm12, %v628_v11, %v630_v21 }
 0x145   : > { %701 = vrot.lane.b32.xlu0 %v1431_v0, %s1286_s28  ;;  %742 = vrot.lane.b32.xlu1 %v1431_v0, %s1287_s29  ;;  %v637_v23 = vsel %vm240_vm5, %v633_v22, 0.0  ;;  %s1183_s28 = scalar_lea.vmem %s1182_s23, 512 }
 0x146   : > { %v1675_v29 = vsel %vm306_vm10, %v637_v23, %v654_v14 }
 0x147   : > { %v626_v56 = vpop.permute.xlu1 %625  ;;  %v671_v30 = vpop.permute.xlu0 %670 }
 0x148   : > { %v632_v31 = vsel %vm631_vm12, %v626_v56, %v628_v11  ;;  %v674_v36 = vsel %vm672_vm15, %v669_v19, %v671_v30  ;;  %vm761_vm12 = vcmask 400384  }
 0x149   : > { %785 = vrot.lane.b32.xlu0 %v1440_v2, %s1276_s11  ;;  %787 = vrot.lane.b32.xlu1 %v779_v24, %s1276_s11  ;;  %v636_v32 = vsel %vm239_vm11, %v632_v31, 0.0  ;;  %v678_v1 = vsel %vm256_vm7, %v674_v36, 0.0 }
 0x14a   : > { %v1683_v33 = vsel %vm306_vm10, %v636_v32, %v653_v25 }
 0x14b   : > { %v684_v37 = vpop.permute.xlu1 %683  ;;  %v667_v39 = vpop.permute.xlu0 %666 }
 0x14c   : > { %v673_v2 = vsel %vm672_vm15, %v667_v39, %v669_v19  ;;  %vm613_vm15 = vcmask 654336  }
 0x14d   : > { %783 = vrot.lane.b32.xlu0 %v1431_v0, %s1276_s11  ;;  %825 = vperm.xlu1 %1141, %v822_v35   ;;  %v677_v41 = vsel %vm255_vm9, %v673_v2, 0.0  ;;  %s1014_s11 = sshll.u32 %s1420_s6, 4 }
 0x14e   : > { %s200_s24 = scalar_lea.vmem [#allocation6], %s1014_s11 }
 0x14f   : > { %v682_v42 = vpop.permute.xlu1 %681  ;;  %v686_v44 = vpop.permute.xlu0 %685  ;;  %s927_s7 = sshll.u32 %s200_s24, 4  ;;  %s1754_s7 = int_to_ptr.vmem [resolvable:$true] %s927_s7 }
 0x150   : > { %v688_v48 = vsel %vm687_vm3, %v682_v42, %v684_v37  ;;  %v689_v50 = vsel %vm687_vm3, %v684_v37, %v686_v44  ;;  %vm707_vm3 = vcmask 424960   ;;  %s1177_s15 = scalar_lea.vmem %s1754_s7, 256  ;;  %p1184_p5 = scmp.lt.s32.totalorder %s1754_s7, %s1182_s23 }
 0x151   : > { %v1695_v3 = vsel %vm306_vm10, %v677_v41, %v688_v48  ;;  %v693_v53 = vsel %vm306_vm10, %v678_v1, %v689_v50  ;;  %v795_v48 = vld [vmem:[%s1802_s1] sm:$0xff]  ;;  %p1178_p8 = scmp.ne.s32.totalorder %s1754_s7, %s1177_s15  ;;  %p1185_p13 = scmp.lt.s32.totalorder %s1183_s28, %s1177_s15 }
 0x152   : > { %v1040_v54 = vpack.c.bf16 %v693_v53, %v1675_v29  ;;  %v1042_v0 = vpack.c.bf16 %v1695_v3, %v1683_v33 }
 0x153   : > { %v719_v55 = vpop.permute.xlu1 %718  ;;  %v717_v10 = vpop.permute.xlu0 %716  ;;  %p1179_p11 = pnand %p1178_p8, %p1812_p9  ;;  %p1186_p2 = por %p1185_p13, %p1184_p5 }
 0x154   : > { %v722_v13 = vsel %vm720_vm8, %v717_v10, %v719_v55 }
 0x155   : > { %v726_v19 = vsel %vm240_vm5, %v722_v13, 0.0  ;;  %p1180_p0 = pneg %p1179_p11 }
 0x156   : > { %v730_v22 = vrot.slane %v726_v19, 4 }
 0x157   : > { %v760_v57 = vpop.permute.xlu1 %759  ;;  %v758_v58 = vpop.permute.xlu0 %757  ;;  %p1187_p4 = pnand %p1186_p2, %p1180_p0 }
 0x19b   : > { %v403_v59 = vpop.permute.xlu1 %402  ;;  %v399_v60 = vpop.permute.xlu0 %398 }
 0x1a3   : > { %v608_v61 = vpop.permute.xlu1 %607  ;;  %v612_v5 = vpop.permute.xlu0 %611 }
 0x1a7   : > { %v756_v6 = vpop.permute.xlu1 %755  ;;  %v401_v7 = vpop.permute.xlu0 %400 }
 0x1a8   : > { %v405_v9 = vsel %vm404_vm4, %v399_v60, %v401_v7  ;;  %v406_v52 = vsel %vm404_vm4, %v401_v7, %v403_v59  ;;  %vm748_vm4 = vcmask 408576   ;;  %v762_v29 = vsel %vm761_vm12, %v756_v6, %v758_v58 }
 0x1a9   : > { %v1028_v11 = vpack.c.bf16 %v1576_v47, %v406_v52  ;;  %v1030_v12 = vpack.c.bf16 %v1573_v46, %v405_v9  ;;  %v763_v47 = vsel %vm761_vm12, %v758_v58, %v760_v57  ;;  %v766_v17 = vsel %vm255_vm9, %v762_v29, 0.0 }
 0x1aa   : > { %v767_v38 = vsel %vm256_vm7, %v763_v47, 0.0  ;;  %v770_v35 = vrot.slane %v766_v17, 4 }
 0x1ab   : > { %v706_v14 = vpop.permute.xlu1 %705  ;;  %v715_v18 = vpop.permute.xlu0 %714  ;;  %1029 = vmatprep.subr.bf16.mxu0 %v1028_v11  ;;  %v771_v26 = vrot.slane %v767_v38, 4 }
 0x1ac   : > { %1031 = vmatpush1.bf16.msra.mxu0 %v1030_v12  ;;  %v721_v56 = vsel %vm720_vm8, %v715_v18, %v717_v10 }
 0x1ad   : > { %1033 = vmatprep.subr.bf16.mxu0 %v1032_v20  ;;  %v725_v27 = vsel %vm239_vm11, %v721_v56, 0.0 }
 0x1ae   : > { %v729_v36 = vrot.slane %v725_v27, 4 }
 0x1af   : > { %v610_v21 = vpop.permute.xlu1 %609  ;;  %v704_v46 = vpop.permute.xlu0 %703 }
 0x1b0   : > { %v614_v23 = vsel %vm613_vm15, %v608_v61, %v610_v21  ;;  %v615_v24 = vsel %vm613_vm15, %v610_v21, %v612_v5  ;;  %v709_v25 = vsel %vm707_vm3, %v704_v46, %v706_v14  ;;  %1035 = vmatpush1.bf16.msra.mxu0 %v1034_v28 }
 0x1b1   : > { %v713_v8 = vsel %vm232_vm2, %v709_v25, 0.0  ;;  %v1036_v15 = vpack.c.bf16 %v615_v24, %v1654_v63  ;;  %v1038_v20 = vpack.c.bf16 %v614_v23, %v1657_v4 }
 0x1b2   : > { %v734_v30 = vsel %vm306_vm10, %v713_v8, %v730_v22 }
 0x1b3   : > { %v747_v31 = vpop.permute.xlu1 %746  ;;  %v745_v32 = vpop.permute.xlu0 %744  ;;  %1037 = vmatprep.subr.bf16.mxu0 %v1036_v15 }
 0x1b4   : > { %v750_v43 = vsel %vm748_vm4, %v745_v32, %v747_v31  ;;  %1039 = vmatpush1.bf16.msra.mxu0 %v1038_v20 }
 0x1b5   : > { %v754_v28 = vsel %vm248_vm13, %v750_v43, 0.0  ;;  %1041 = vmatprep.subr.bf16.mxu0 %v1040_v54 }
 0x1b6   : > { %v775_v63 = vsel %vm306_vm10, %v754_v28, %v771_v26 }
 0x1b7   : > { %v743_v4 = vpop.permute.xlu1 %742  ;;  %v702_v33 = vpop.permute.xlu0 %701  ;;  %v1044_v34 = vpack.c.bf16 %v775_v63, %v734_v30 }
 0x1b8   : > { %v749_v37 = vsel %vm748_vm4, %v743_v4, %v745_v32  ;;  %v708_v39 = vsel %vm707_vm3, %v702_v33, %v704_v46  ;;  %1043 = vmatpush1.bf16.msra.mxu0 %v1042_v0 }
 0x1b9   : > { %v753_v45 = vsel %vm247_vm14, %v749_v37, 0.0  ;;  %v712_v49 = vsel %vm231_vm1, %v708_v39, 0.0  ;;  %1045 = vmatprep.subr.bf16.mxu0 %v1044_v34 }
 0x1ba   : > { %v774_v51 = vsel %vm306_vm10, %v753_v45, %v770_v35  ;;  %v733_v40 = vsel %vm306_vm10, %v712_v49, %v729_v36 }
 0x1bb   : > { %v788_v2 = vpop.permute.xlu1 %787  ;;  %v786_v1 = vpop.permute.xlu0 %785  ;;  %v1046_v41 = vpack.c.bf16 %v774_v51, %v733_v40 }
 0x1bc   : > { %v790_v42 = vsel %vm596_vm6, %v786_v1, %v788_v2 }
 0x1bd   : > { %794 = vst [vmem:[#allocation2 + $0xc8] sm:$0xf] %v790_v42  ;;  %1047 = vmatpush1.bf16.msra.mxu0 %v1046_v41 }
 0x1bf   : > { %v784_v44 = vpop.permute.xlu0 %783 }
 0x1c0   : > { %v789_v62 = vsel %vm596_vm6, %v784_v44, %v786_v1 }
 0x1c1   : > { %793 = vst [vmem:[#allocation2 + $0xc0] sm:$0xf] %v789_v62 }
 0x1c4   : > { %v821_v16 = vld [vmem:[#allocation2 + $0xc8] sm:$0xf] }
 0x1c5   : > { %1015 = vmatprep.subr.msk.mxu0 %vm306_vm10, %v821_v16 }
 0x1c8   : > { %v820_v50 = vld [vmem:[#allocation2 + $0xc0] sm:$0xf] }
 0x1c9   : > { %1016 = vmatpush1.msk.msra.mxu0 %vm306_vm10, %v820_v50 }
 0x1ca   : > { %1017 = vmatmul.mubr.msk.f32.vlgmr.msra.gmra.mrb[0].mxu0 %vm371_vm0, %v795_v48 }
 0x1cc   : > { %v826_v3 = vpop.permute.xlu1 %825 }
 0x29d   : > { %v903_v53 = vpop.f32.mrb[0].mxu0 }
 0x29e   : > { %v904_v54 = vadd.f32 %v903_v53, %v826_v3  ;;  %v905_v0 = vpop.f32.mrb[1].mxu0 }
 0x29f   : > { %v906_v55 = vadd.f32 %v905_v0, %v826_v3 }
 0x2a0   : > { %908 = vst [vmem:[%s200_s24] sm:$0xff] %v904_v54 }
 0x2a1   : > { %909 = vst [vmem:[%s200_s24 + $0x8] sm:$0xff] %v906_v55 }
 0x2a2   : > { %1190 = shalt.err (!%p1187_p4)
}
 0x2a3   : > { %s1191_s6 = scalar_lea.hbm %s1752_s19, 256  ;;  %s1195_s30 = scalar_lea.hbm %s1804_s3, 512 }
 0x2a4   : > { %p1192_p6 = scmp.ne.s32.totalorder %s1752_s19, %s1191_s6  ;;  %p1196_p12 = scmp.lt.u32.totalorder %s1752_s19, %s1804_s3 }
 0x2a5   : > { %p1197_p1 = scmp.lt.u32.totalorder %s1195_s30, %s1191_s6  ;;  %p1199_p8 = scmp.lt.u32.totalorder %s1191_s6, %s1752_s19 }
 0x2a6   : > { %p1193_p7 = pnand %p1192_p6, %p1812_p9 }
 0x2a7   : > { %p1198_p3 = por %p1197_p1, %p1196_p12 }
 0x2a8   : > { %p1194_p10 = pneg %p1193_p7 }
 0x2a9   : > { %p1200_p11 = por %p1199_p8, %p1198_p3 }
 0x2ab   : > { %p1201_p0 = pnand %p1200_p11, %p1194_p10 }
 0x2ad   : > { %1204 = shalt.err (!%p1201_p0)
}
 0x2ae   : > { %1053 = dma.vmem_to_hbm [thread:$0]  (%p1812_p9), %s1754_s7, 256, %s1752_s19, %s911_s21  }
 0x2af PF: > { %s939_s11 = sand.u32 1, %s1239_s12   ;;  %p1813_p5 = scmp.ne.s32.totalorder %s1809_s27, 0 }
 0x2b0   : > { %p1814_p13 = scmp.ge.s32.totalorder %s1259_s17, 2  ;;  %s940_s4 = scalar_lea.sflag [#allocation5], %s939_s11 }
 0x2b2   : > { %p1060_p2 = pnand %p1814_p13, %p1813_p5 }
 0x2b4   : > { %1234 = dma.done.wait (!%p1060_p2), %s940_s4, 256  }
 0x2b5   : > { %1236 = vsyncadd (!%p1060_p2), %s940_s4, 4294967040  ;;  %s19_s17 = sadd.s32 1, %s1259_s17   ;;  %s1815_s12 = smov %s1243_s13 }
 0x2b6   : > { %p16_p4 = scmp.ge.s32.totalorder %s19_s17, 4   ;;  %s1816_s13 = smov %s1247_s14 }
 0x2b7   : > { %s1817_s14 = smov %s1367_s26  ;;  %s1818_s15 = smov %s1255_s16 }
 0x2b8   : > { %s1819_s16 = smov %s1821_s20  ;;  %18 = sbr.rel (!%p16_p4) target bundleno = 6 (0x6), region = 77 }
 0x2bf   :  { %945 = vsyncpa [#allocation4], 1 }
 0x2c0   :  { %947 = vsyncpa [#allocation4 + $0x1], 1 }
 0x2c1   :  { %948 = vsyncpa [#allocation5], 1 }
 0x2c2   :  { %950 = vsyncpa [#allocation5 + $0x1], 1 }

</bundles_post_ra>
